<compile_context>
chip_gen: v6e
topology: v6e:2x2x1
jax: 0.10.0
libtpu: 0.0.40
codegen_flags: <defaults>
</compile_context>

<pallas_src>
import functools
import math

import jax
import jax.numpy as jnp
from jax.experimental import pallas as pl
from jax.experimental.pallas import tpu as pltpu


# -----------------------------------------------------------------------------
# Fused transformer + projection-head kernel
# -----------------------------------------------------------------------------
def _fused_kernel(num_layers, nh, hd, mask_value,
                  x_ref, kp_ref,
                  wqkv_ref, bqkv_ref, wo_ref, bo_ref,
                  g1_ref, be1_ref, w1_ref, b1_ref, w2_ref, b2_ref,
                  g2_ref, be2_ref,
                  pw_ref, pb_ref, o_ref):
    """All transformer layers + H->1 projection for a (Bb, S, H) batch block."""
    f32 = jnp.float32
    bf16 = jnp.bfloat16

    Bb, S, H = x_ref.shape
    x = x_ref[...].reshape(Bb * S, H)                # fold batch into sublanes

    # --- additive attention bias, built ONCE and reused across layers --------
    row = jax.lax.broadcasted_iota(jnp.int32, (Bb, S, S), 1)
    col = jax.lax.broadcasted_iota(jnp.int32, (Bb, S, S), 2)
    kp = kp_ref[...]                                 # (Bb, S), 1.0 at padded keys
    masked = (col > row) | (kp[:, None, :] > 0.5)    # causal | key padding
    bias = jnp.where(masked, f32(mask_value), f32(0.0))   # (Bb, S, S) f32

    scale = 1.0 / math.sqrt(hd)

    # Static unrolled layer loop (num_layers is tiny); weights are indexed by a
    # static leading-axis layer index into the stacked weight refs.
    for layer in range(num_layers):
        x_bf = x.astype(bf16)

        # ---- fused Q/K/V projection: one (Bb*S, H) x (H, 3H) matmul ----------
        qkv = (jnp.dot(x_bf, wqkv_ref[layer], preferred_element_type=f32)
               + bqkv_ref[layer])                    # (Bb*S, 3H) f32

        heads = []
        for h in range(nh):
            q = qkv[:, h * hd:(h + 1) * hd].reshape(Bb, S, hd) * scale
            k = qkv[:, H + h * hd:H + (h + 1) * hd].reshape(Bb, S, hd)
            v = qkv[:, 2 * H + h * hd:2 * H + (h + 1) * hd].reshape(Bb, S, hd)

            s = jnp.einsum('bqd,bkd->bqk', q.astype(bf16), k.astype(bf16),
                           preferred_element_type=f32) + bias
            m = jnp.max(s, axis=-1, keepdims=True)
            p = jnp.exp(s - m)                       # unnormalized probs
            lsum = jnp.sum(p, axis=-1, keepdims=True)
            oh = jnp.einsum('bqk,bkd->bqd', p.astype(bf16), v.astype(bf16),
                            preferred_element_type=f32)
            # deferred softmax normalization on the EUP slot
            oh = oh * pl.reciprocal(lsum, approx=True)
            heads.append(oh)                         # (Bb, S, hd)

        # ---- output projection: single (Bb*S, H) x (H, H) matmul -------------
        attn = jnp.concatenate(heads, axis=-1).reshape(Bb * S, H)
        attn = (jnp.dot(attn.astype(bf16), wo_ref[layer],
                        preferred_element_type=f32) + bo_ref[layer])

        # ---- residual + LayerNorm 1 (rsqrt on EUP) ----------------------------
        x1 = x + attn
        mu = jnp.mean(x1, axis=-1, keepdims=True)
        var = jnp.mean(jnp.square(x1 - mu), axis=-1, keepdims=True)
        x1 = (x1 - mu) * jax.lax.rsqrt(var + 1e-5) * g1_ref[layer] + be1_ref[layer]

        # ---- bottleneck FFN + residual + LayerNorm 2 --------------------------
        h1 = jnp.maximum(
            jnp.dot(x1.astype(bf16), w1_ref[layer], preferred_element_type=f32)
            + b1_ref[layer], 0.0)
        h2 = (jnp.dot(h1.astype(bf16), w2_ref[layer], preferred_element_type=f32)
              + b2_ref[layer])
        x2 = x1 + h2
        mu2 = jnp.mean(x2, axis=-1, keepdims=True)
        var2 = jnp.mean(jnp.square(x2 - mu2), axis=-1, keepdims=True)
        x = (x2 - mu2) * jax.lax.rsqrt(var2 + 1e-5) * g2_ref[layer] + be2_ref[layer]

    # --- fused H->1 projection head: broadcast-mul + lane reduction -----------
    y = jnp.sum(x * pw_ref[...], axis=-1, keepdims=True) + pb_ref[0, 0]  # (Bb*S, 1)
    o_ref[...] = y.reshape(Bb, S, 1)                 # squeeze done in the wrapper


# -----------------------------------------------------------------------------
# pallas_call wrapper
# -----------------------------------------------------------------------------
def _tensorcores_per_chip() -> int:
    """Best-effort TC-per-chip query; safe fallback is 1 (collapse the grid)."""
    for getter in (lambda: pltpu.get_tpu_info(), lambda: jax.devices()[0]):
        try:
            obj = getter()
        except Exception:
            continue
        for attr in ("num_cores", "core_count", "num_tensorcores",
                     "tensorcores_per_chip", "cores_per_chip"):
            v = getattr(obj, attr, None)
            if isinstance(v, int) and 1 <= v <= 8:
                return v
    return 1


def _vmem_limit_bytes(L, Bb, S, H, F):
    """Resident-set estimate, capped at ~60% of the physical per-TC VMEM."""
    bf, f4 = 2, 4
    weights = L * (H * 3 * H + H * H + H * F + F * H) * bf
    small = L * (3 * H + 6 * H + F) * f4 + (H + 2) * f4
    blocks = (Bb * S * H + Bb * S + Bb * S) * f4
    scratch = (3 * Bb * S * H + 4 * Bb * S * S + 6 * Bb * S * H
               + 2 * Bb * S * F) * f4
    est = 2 * (weights + small + blocks) + scratch + (4 << 20)
    try:
        cap = int(getattr(pltpu.get_tpu_info(), "vmem_capacity_bytes", 64 << 20))
    except Exception:
        cap = 64 << 20          # conservative: v7x per-TC VMEM
    hi = int(cap * 0.6)
    return int(min(max(est, 16 << 20), hi))


def fused_transformer(x, key_pad, st, proj_w, proj_b, num_heads, mask_value):
    """x: (B, S, H) f32; key_pad: (B, S) f32.  Returns (B, S) f32 logits."""
    B, S, H = x.shape
    L = st["wqkv"].shape[0]
    F = st["w1"].shape[-1]
    nh = num_heads
    hd = H // nh

    # One grid step per TensorCore: single step on 1-TC chips (v5e/v6e),
    # 2-way "parallel" batch split on dual-TC chips (v7x).
    cores = _tensorcores_per_chip()
    Bb = B // cores if (cores > 1 and B % cores == 0) else B
    G = B // Bb

    def full(shape):
        n = len(shape)
        return pl.BlockSpec(shape, lambda b, _n=n: (0,) * _n)

    in_specs = [
        pl.BlockSpec((Bb, S, H), lambda b: (b, 0, 0)),   # residual stream
        pl.BlockSpec((Bb, S), lambda b: (b, 0)),         # key-padding row
        full((L, H, 3 * H)), full((L, 1, 3 * H)),        # wqkv, bqkv (stacked)
        full((L, H, H)), full((L, 1, H)),                # wo, bo
        full((L, 1, H)), full((L, 1, H)),                # ln1 gamma, beta
        full((L, H, F)), full((L, 1, F)),                # ffn w1, b1
        full((L, F, H)), full((L, 1, H)),                # ffn w2, b2
        full((L, 1, H)), full((L, 1, H)),                # ln2 gamma, beta
        full((1, H)), full((1, 1)),                      # proj_w, proj_b
    ]
    kernel = functools.partial(_fused_kernel, L, nh, hd, mask_value)

    out = pl.pallas_call(
        kernel,
        out_shape=jax.ShapeDtypeStruct((B, S, 1), jnp.float32),
        grid_spec=pltpu.PrefetchScalarGridSpec(
            num_scalar_prefetch=0,
            grid=(G,),
            in_specs=in_specs,
            out_specs=pl.BlockSpec((Bb, S, 1), lambda b: (b, 0, 0)),
        ),
        compiler_params=pltpu.CompilerParams(
            dimension_semantics=("parallel",),
            vmem_limit_bytes=_vmem_limit_bytes(L, Bb, S, H, F)),
    )(x, key_pad,
      st["wqkv"], st["bqkv"], st["wo"], st["bo"], st["g1"], st["be1"],
      st["w1"], st["b1"], st["w2"], st["b2"], st["g2"], st["be2"],
      proj_w, proj_b)
    return out[..., 0]


# -----------------------------------------------------------------------------
# Parameter init + full forward (glue in plain JAX)
# -----------------------------------------------------------------------------
def init_params(key, num_words, seq_len, max_lag_time, max_pqet,
                num_layers, num_heads, hidden_dims, bottleneck):
    H = hidden_dims
    F = max(1, H // bottleneck)
    keys = iter(jax.random.split(key, 16 + 8 * num_layers))
    nrm = lambda shape: jax.random.normal(next(keys), shape, jnp.float32) * 0.02

    wqkv, bqkv, wo, bo = [], [], [], []
    g1, be1, w1, b1, w2, b2, g2, be2 = ([] for _ in range(8))
    for _ in range(num_layers):
        wqkv.append(jnp.concatenate([nrm((H, H)), nrm((H, H)), nrm((H, H))],
                                    axis=1).astype(jnp.bfloat16))     # (H, 3H)
        bqkv.append(jnp.zeros((1, 3 * H), jnp.float32))
        wo.append(nrm((H, H)).astype(jnp.bfloat16))
        bo.append(jnp.zeros((1, H), jnp.float32))
        g1.append(jnp.ones((1, H), jnp.float32))
        be1.append(jnp.zeros((1, H), jnp.float32))
        w1.append(nrm((H, F)).astype(jnp.bfloat16))
        b1.append(jnp.zeros((1, F), jnp.float32))
        w2.append(nrm((F, H)).astype(jnp.bfloat16))
        b2.append(jnp.zeros((1, H), jnp.float32))
        g2.append(jnp.ones((1, H), jnp.float32))
        be2.append(jnp.zeros((1, H), jnp.float32))

    return {
        "tok_emb": nrm((num_words, H)),
        "pos_emb": nrm((seq_len, H)),
        "aux": {
            "lag_time": nrm((max_lag_time, H)),
            "pq_elapsed_time": nrm((max_pqet, H)),
            "pq_had_explanation": nrm((3, H)),
            "pq_answered_correctly": nrm((3, H)),
        },
        # per-layer weights stacked along a leading layer axis (single kernel)
        "stack": {
            "wqkv": jnp.stack(wqkv), "bqkv": jnp.stack(bqkv),
            "wo": jnp.stack(wo), "bo": jnp.stack(bo),
            "g1": jnp.stack(g1), "be1": jnp.stack(be1),
            "w1": jnp.stack(w1), "b1": jnp.stack(b1),
            "w2": jnp.stack(w2), "b2": jnp.stack(b2),
            "g2": jnp.stack(g2), "be2": jnp.stack(be2),
        },
        "proj_w": nrm((1, H)),                       # f32, used as mul + reduce
        "proj_b": jnp.zeros((1, 1), jnp.float32),
    }


def finetuning_forward(params, x, pad_idx, num_heads, mask_value=-1e9):
    """x: dict of int32 arrays, each (B, S).  Returns (B, S) float32 logits."""
    content_id = x["content_id"]

    # auxiliary categorical embeddings (sum) + token emb + positional emb (glue)
    aux = 0.0
    for key, table in params["aux"].items():
        aux = aux + jnp.take(table, x[key], axis=0)
    h = (jnp.take(params["tok_emb"], content_id, axis=0)
         + params["pos_emb"][None, :, :]
         + aux).astype(jnp.float32)

    # only the (B, S) key-padding row enters the kernel; the full causal +
    # padding additive bias is built on-chip, once, and reused across layers.
    key_pad = (content_id == pad_idx).astype(jnp.float32)

    return fused_transformer(h, key_pad, params["stack"],
                             params["proj_w"], params["proj_b"],
                             num_heads, mask_value)


# -----------------------------------------------------------------------------
if __name__ == "__main__":
    # small, module-consistent shapes
    B, S, H = 2, 8, 32
    num_words, pad_idx = 50, 0
    max_lag_time, max_pqet = 10, 10
    num_layers, num_heads, bottleneck = 2, 2, 4

    root = jax.random.PRNGKey(0)
    kp, k1, k2, k3, k4, k5 = jax.random.split(root, 6)

    params = init_params(kp, num_words, S, max_lag_time, max_pqet,
                         num_layers, num_heads, H, bottleneck)

    content_id = jax.random.randint(k1, (B, S), 1, num_words, jnp.int32)
    content_id = content_id.at[:, -2:].set(pad_idx)   # exercise padding mask
    inputs = {
        "content_id": content_id,
        "lag_time": jax.random.randint(k2, (B, S), 0, max_lag_time, jnp.int32),
        "pq_elapsed_time": jax.random.randint(k3, (B, S), 0, max_pqet, jnp.int32),
        "pq_had_explanation": jax.random.randint(k4, (B, S), 0, 3, jnp.int32),
        "pq_answered_correctly": jax.random.randint(k5, (B, S), 0, 3, jnp.int32),
    }

    out = finetuning_forward(params, inputs, pad_idx, num_heads)
    out = jax.block_until_ready(out)
    assert out.shape == (B, S) and out.dtype == jnp.float32
    assert bool(jnp.all(jnp.isfinite(out)))
    print("KERNEL_OK")
</pallas_src>

<mosaic_0001>
module attributes {stable_mosaic.version = 11 : i64} {
  func.func @_fused_kernel(%arg0: i32, %arg1: memref<2x8x32xf32, #tpu.memory_space<vmem>>, %arg2: memref<2x8xf32, #tpu.memory_space<vmem>>, %arg3: memref<2x32x96xbf16, #tpu.memory_space<vmem>>, %arg4: memref<2x1x96xf32, #tpu.memory_space<vmem>>, %arg5: memref<2x32x32xbf16, #tpu.memory_space<vmem>>, %arg6: memref<2x1x32xf32, #tpu.memory_space<vmem>>, %arg7: memref<2x1x32xf32, #tpu.memory_space<vmem>>, %arg8: memref<2x1x32xf32, #tpu.memory_space<vmem>>, %arg9: memref<2x32x8xbf16, #tpu.memory_space<vmem>>, %arg10: memref<2x1x8xf32, #tpu.memory_space<vmem>>, %arg11: memref<2x8x32xbf16, #tpu.memory_space<vmem>>, %arg12: memref<2x1x32xf32, #tpu.memory_space<vmem>>, %arg13: memref<2x1x32xf32, #tpu.memory_space<vmem>>, %arg14: memref<2x1x32xf32, #tpu.memory_space<vmem>>, %arg15: memref<1x32xf32, #tpu.memory_space<vmem>>, %arg16: memref<1x1xf32, #tpu.memory_space<vmem>>, %arg17: memref<2x8x1xf32, #tpu.memory_space<vmem>>) attributes {dimension_semantics = [#tpu.dimension_semantics<parallel>], iteration_bounds = array<i64: 1>, scalar_prefetch = 0 : i64, scratch_operands = 0 : i64, tpu.core_type = #tpu.core_type<tc>, window_params = [{transform_indices = @transform_0, window_bounds = array<i64: 2, 8, 32>}, {transform_indices = @transform_1, window_bounds = array<i64: 2, 8>}, {pipeline_mode = #tpu.pipeline_mode<synchronous>, transform_indices = @transform_2, window_bounds = array<i64: 2, 32, 96>}, {pipeline_mode = #tpu.pipeline_mode<synchronous>, transform_indices = @transform_3, window_bounds = array<i64: 2, 1, 96>}, {pipeline_mode = #tpu.pipeline_mode<synchronous>, transform_indices = @transform_4, window_bounds = array<i64: 2, 32, 32>}, {pipeline_mode = #tpu.pipeline_mode<synchronous>, transform_indices = @transform_5, window_bounds = array<i64: 2, 1, 32>}, {pipeline_mode = #tpu.pipeline_mode<synchronous>, transform_indices = @transform_6, window_bounds = array<i64: 2, 1, 32>}, {pipeline_mode = #tpu.pipeline_mode<synchronous>, transform_indices = @transform_7, window_bounds = array<i64: 2, 1, 32>}, {pipeline_mode = #tpu.pipeline_mode<synchronous>, transform_indices = @transform_8, window_bounds = array<i64: 2, 32, 8>}, {pipeline_mode = #tpu.pipeline_mode<synchronous>, transform_indices = @transform_9, window_bounds = array<i64: 2, 1, 8>}, {pipeline_mode = #tpu.pipeline_mode<synchronous>, transform_indices = @transform_10, window_bounds = array<i64: 2, 8, 32>}, {pipeline_mode = #tpu.pipeline_mode<synchronous>, transform_indices = @transform_11, window_bounds = array<i64: 2, 1, 32>}, {pipeline_mode = #tpu.pipeline_mode<synchronous>, transform_indices = @transform_12, window_bounds = array<i64: 2, 1, 32>}, {pipeline_mode = #tpu.pipeline_mode<synchronous>, transform_indices = @transform_13, window_bounds = array<i64: 2, 1, 32>}, {pipeline_mode = #tpu.pipeline_mode<synchronous>, transform_indices = @transform_14, window_bounds = array<i64: 1, 32>}, {pipeline_mode = #tpu.pipeline_mode<synchronous>, transform_indices = @transform_15, window_bounds = array<i64: 1, 1>}, {transform_indices = @transform_16, window_bounds = array<i64: 2, 8, 1>}]} {
    %c0 = arith.constant 0 : index
    %c0_0 = arith.constant 0 : index
    %c0_1 = arith.constant 0 : index
    %0 = vector.load %arg1[%c0, %c0_0, %c0_1] : memref<2x8x32xf32, #tpu.memory_space<vmem>>, vector<2x8x32xf32>
    %1 = vector.shape_cast %0 : vector<2x8x32xf32> to vector<16x32xf32>
    %2 = tpu.iota {dimensions = array<i32: 1>} : vector<2x8x8xi32>
    %3 = tpu.iota {dimensions = array<i32: 2>} : vector<2x8x8xi32>
    %c0_2 = arith.constant 0 : index
    %c0_3 = arith.constant 0 : index
    %4 = vector.load %arg2[%c0_2, %c0_3] : memref<2x8xf32, #tpu.memory_space<vmem>>, vector<2x8xf32>
    %5 = arith.cmpi sgt, %3, %2 : vector<2x8x8xi32>
    %6 = vector.shape_cast %4 : vector<2x8xf32> to vector<2x1x8xf32>
    %cst = arith.constant 5.000000e-01 : f32
    %7 = vector.broadcast %cst : f32 to vector<2x1x8xf32>
    %8 = arith.cmpf ogt, %6, %7 : vector<2x1x8xf32>
    %9 = vector.broadcast %8 : vector<2x1x8xi1> to vector<2x8x8xi1>
    %10 = arith.ori %5, %9 : vector<2x8x8xi1>
    %cst_4 = arith.constant -1.000000e+09 : f32
    %cst_5 = arith.constant 0.000000e+00 : f32
    %11 = vector.broadcast %cst_4 : f32 to vector<2x8x8xf32>
    %12 = vector.broadcast %cst_5 : f32 to vector<2x8x8xf32>
    %13 = arith.select %10, %11, %12 : vector<2x8x8xi1>, vector<2x8x8xf32>
    %14 = arith.truncf %1 : vector<16x32xf32> to vector<16x32xbf16>
    %c0_6 = arith.constant 0 : index
    %c0_7 = arith.constant 0 : index
    %c0_8 = arith.constant 0 : index
    %15 = vector.load %arg3[%c0_6, %c0_7, %c0_8] : memref<2x32x96xbf16, #tpu.memory_space<vmem>>, vector<1x32x96xbf16>
    %16 = vector.shape_cast %15 : vector<1x32x96xbf16> to vector<32x96xbf16>
    %cst_9 = arith.constant dense<0.000000e+00> : vector<16x96xf32>
    %17 = tpu.matmul %14, %16, %cst_9 {dimension_numbers = #tpu.dot_dimension_numbers<[1], [0], [0], [1], [0, 0, 1, 1], [], []>} : vector<16x32xbf16>, vector<32x96xbf16>, vector<16x96xf32> -> vector<16x96xf32>
    %c0_10 = arith.constant 0 : index
    %c0_11 = arith.constant 0 : index
    %c0_12 = arith.constant 0 : index
    %18 = vector.load %arg4[%c0_10, %c0_11, %c0_12] : memref<2x1x96xf32, #tpu.memory_space<vmem>>, vector<1x1x96xf32>
    %19 = vector.shape_cast %18 : vector<1x1x96xf32> to vector<1x96xf32>
    %20 = vector.broadcast %19 : vector<1x96xf32> to vector<16x96xf32>
    %21 = arith.addf %17, %20 : vector<16x96xf32>
    %22 = vector.extract_strided_slice %21 {offsets = [0, 0], sizes = [16, 16], strides = [1, 1]} : vector<16x96xf32> to vector<16x16xf32>
    %23 = vector.shape_cast %22 : vector<16x16xf32> to vector<2x8x16xf32>
    %cst_13 = arith.constant 2.500000e-01 : f32
    %24 = vector.broadcast %cst_13 : f32 to vector<2x8x16xf32>
    %25 = arith.mulf %23, %24 : vector<2x8x16xf32>
    %26 = vector.extract_strided_slice %21 {offsets = [0, 32], sizes = [16, 16], strides = [1, 1]} : vector<16x96xf32> to vector<16x16xf32>
    %27 = vector.shape_cast %26 : vector<16x16xf32> to vector<2x8x16xf32>
    %28 = vector.extract_strided_slice %21 {offsets = [0, 64], sizes = [16, 16], strides = [1, 1]} : vector<16x96xf32> to vector<16x16xf32>
    %29 = vector.shape_cast %28 : vector<16x16xf32> to vector<2x8x16xf32>
    %30 = arith.truncf %25 : vector<2x8x16xf32> to vector<2x8x16xbf16>
    %31 = arith.truncf %27 : vector<2x8x16xf32> to vector<2x8x16xbf16>
    "tpu.trace_start"() <{level = 10 : i32, message = "bqd,bkd->bqk"}> : () -> ()
    %cst_14 = arith.constant dense<0.000000e+00> : vector<2x8x8xf32>
    %32 = tpu.matmul %30, %31, %cst_14 {dimension_numbers = #tpu.dot_dimension_numbers<[2], [2], [1], [1], [0, 0, 0, 1, 1, 1], [0], [0]>} : vector<2x8x16xbf16>, vector<2x8x16xbf16>, vector<2x8x8xf32> -> vector<2x8x8xf32>
    "tpu.trace_stop"() : () -> ()
    %33 = arith.addf %32, %13 : vector<2x8x8xf32>
    %cst_15 = arith.constant dense<0xFF800000> : vector<2x8xf32>
    %34 = vector.multi_reduction <maximumf>, %33, %cst_15 [2] : vector<2x8x8xf32> to vector<2x8xf32>
    %35 = vector.shape_cast %34 : vector<2x8xf32> to vector<2x8x1xf32>
    %36 = vector.broadcast %35 : vector<2x8x1xf32> to vector<2x8x8xf32>
    %37 = arith.subf %33, %36 : vector<2x8x8xf32>
    %38 = math.exp %37 : vector<2x8x8xf32>
    %cst_16 = arith.constant dense<0.000000e+00> : vector<2x8xf32>
    %39 = vector.multi_reduction <add>, %38, %cst_16 [2] : vector<2x8x8xf32> to vector<2x8xf32>
    %40 = vector.shape_cast %39 : vector<2x8xf32> to vector<2x8x1xf32>
    %41 = arith.truncf %38 : vector<2x8x8xf32> to vector<2x8x8xbf16>
    %42 = arith.truncf %29 : vector<2x8x16xf32> to vector<2x8x16xbf16>
    "tpu.trace_start"() <{level = 10 : i32, message = "bqk,bkd->bqd"}> : () -> ()
    %cst_17 = arith.constant dense<0.000000e+00> : vector<2x8x16xf32>
    %43 = tpu.matmul %41, %42, %cst_17 {dimension_numbers = #tpu.dot_dimension_numbers<[2], [1], [1], [2], [0, 0, 0, 1, 1, 2], [0], [0]>} : vector<2x8x8xbf16>, vector<2x8x16xbf16>, vector<2x8x16xf32> -> vector<2x8x16xf32>
    "tpu.trace_stop"() : () -> ()
    %44 = tpu.reciprocal %40 {approx = true} : vector<2x8x1xf32> -> vector<2x8x1xf32>
    %45 = vector.broadcast %44 : vector<2x8x1xf32> to vector<2x8x16xf32>
    %46 = arith.mulf %43, %45 : vector<2x8x16xf32>
    %47 = vector.extract_strided_slice %21 {offsets = [0, 16], sizes = [16, 16], strides = [1, 1]} : vector<16x96xf32> to vector<16x16xf32>
    %48 = vector.shape_cast %47 : vector<16x16xf32> to vector<2x8x16xf32>
    %cst_18 = arith.constant 2.500000e-01 : f32
    %49 = vector.broadcast %cst_18 : f32 to vector<2x8x16xf32>
    %50 = arith.mulf %48, %49 : vector<2x8x16xf32>
    %51 = vector.extract_strided_slice %21 {offsets = [0, 48], sizes = [16, 16], strides = [1, 1]} : vector<16x96xf32> to vector<16x16xf32>
    %52 = vector.shape_cast %51 : vector<16x16xf32> to vector<2x8x16xf32>
    %53 = vector.extract_strided_slice %21 {offsets = [0, 80], sizes = [16, 16], strides = [1, 1]} : vector<16x96xf32> to vector<16x16xf32>
    %54 = vector.shape_cast %53 : vector<16x16xf32> to vector<2x8x16xf32>
    %55 = arith.truncf %50 : vector<2x8x16xf32> to vector<2x8x16xbf16>
    %56 = arith.truncf %52 : vector<2x8x16xf32> to vector<2x8x16xbf16>
    "tpu.trace_start"() <{level = 10 : i32, message = "bqd,bkd->bqk"}> : () -> ()
    %cst_19 = arith.constant dense<0.000000e+00> : vector<2x8x8xf32>
    %57 = tpu.matmul %55, %56, %cst_19 {dimension_numbers = #tpu.dot_dimension_numbers<[2], [2], [1], [1], [0, 0, 0, 1, 1, 1], [0], [0]>} : vector<2x8x16xbf16>, vector<2x8x16xbf16>, vector<2x8x8xf32> -> vector<2x8x8xf32>
    "tpu.trace_stop"() : () -> ()
    %58 = arith.addf %57, %13 : vector<2x8x8xf32>
    %cst_20 = arith.constant dense<0xFF800000> : vector<2x8xf32>
    %59 = vector.multi_reduction <maximumf>, %58, %cst_20 [2] : vector<2x8x8xf32> to vector<2x8xf32>
    %60 = vector.shape_cast %59 : vector<2x8xf32> to vector<2x8x1xf32>
    %61 = vector.broadcast %60 : vector<2x8x1xf32> to vector<2x8x8xf32>
    %62 = arith.subf %58, %61 : vector<2x8x8xf32>
    %63 = math.exp %62 : vector<2x8x8xf32>
    %cst_21 = arith.constant dense<0.000000e+00> : vector<2x8xf32>
    %64 = vector.multi_reduction <add>, %63, %cst_21 [2] : vector<2x8x8xf32> to vector<2x8xf32>
    %65 = vector.shape_cast %64 : vector<2x8xf32> to vector<2x8x1xf32>
    %66 = arith.truncf %63 : vector<2x8x8xf32> to vector<2x8x8xbf16>
    %67 = arith.truncf %54 : vector<2x8x16xf32> to vector<2x8x16xbf16>
    "tpu.trace_start"() <{level = 10 : i32, message = "bqk,bkd->bqd"}> : () -> ()
    %cst_22 = arith.constant dense<0.000000e+00> : vector<2x8x16xf32>
    %68 = tpu.matmul %66, %67, %cst_22 {dimension_numbers = #tpu.dot_dimension_numbers<[2], [1], [1], [2], [0, 0, 0, 1, 1, 2], [0], [0]>} : vector<2x8x8xbf16>, vector<2x8x16xbf16>, vector<2x8x16xf32> -> vector<2x8x16xf32>
    "tpu.trace_stop"() : () -> ()
    %69 = tpu.reciprocal %65 {approx = true} : vector<2x8x1xf32> -> vector<2x8x1xf32>
    %70 = vector.broadcast %69 : vector<2x8x1xf32> to vector<2x8x16xf32>
    %71 = arith.mulf %68, %70 : vector<2x8x16xf32>
    %72 = tpu.concatenate %46, %71 in 2 : vector<2x8x16xf32>, vector<2x8x16xf32> -> vector<2x8x32xf32>
    %73 = vector.shape_cast %72 : vector<2x8x32xf32> to vector<16x32xf32>
    %74 = arith.truncf %73 : vector<16x32xf32> to vector<16x32xbf16>
    %c0_23 = arith.constant 0 : index
    %c0_24 = arith.constant 0 : index
    %c0_25 = arith.constant 0 : index
    %75 = vector.load %arg5[%c0_23, %c0_24, %c0_25] : memref<2x32x32xbf16, #tpu.memory_space<vmem>>, vector<1x32x32xbf16>
    %76 = vector.shape_cast %75 : vector<1x32x32xbf16> to vector<32x32xbf16>
    %cst_26 = arith.constant dense<0.000000e+00> : vector<16x32xf32>
    %77 = tpu.matmul %74, %76, %cst_26 {dimension_numbers = #tpu.dot_dimension_numbers<[1], [0], [0], [1], [0, 0, 1, 1], [], []>} : vector<16x32xbf16>, vector<32x32xbf16>, vector<16x32xf32> -> vector<16x32xf32>
    %c0_27 = arith.constant 0 : index
    %c0_28 = arith.constant 0 : index
    %c0_29 = arith.constant 0 : index
    %78 = vector.load %arg6[%c0_27, %c0_28, %c0_29] : memref<2x1x32xf32, #tpu.memory_space<vmem>>, vector<1x1x32xf32>
    %79 = vector.shape_cast %78 : vector<1x1x32xf32> to vector<1x32xf32>
    %80 = vector.broadcast %79 : vector<1x32xf32> to vector<16x32xf32>
    %81 = arith.addf %77, %80 : vector<16x32xf32>
    %82 = arith.addf %1, %81 : vector<16x32xf32>
    %cst_30 = arith.constant dense<0.000000e+00> : vector<16xf32>
    %83 = vector.multi_reduction <add>, %82, %cst_30 [1] : vector<16x32xf32> to vector<16xf32>
    %84 = vector.shape_cast %83 : vector<16xf32> to vector<16x1xf32>
    %cst_31 = arith.constant 3.200000e+01 : f32
    %85 = vector.broadcast %cst_31 : f32 to vector<16x1xf32>
    %86 = arith.divf %84, %85 : vector<16x1xf32>
    %87 = vector.broadcast %86 : vector<16x1xf32> to vector<16x32xf32>
    %88 = arith.subf %82, %87 : vector<16x32xf32>
    %89 = arith.mulf %88, %88 : vector<16x32xf32>
    %cst_32 = arith.constant dense<0.000000e+00> : vector<16xf32>
    %90 = vector.multi_reduction <add>, %89, %cst_32 [1] : vector<16x32xf32> to vector<16xf32>
    %91 = vector.shape_cast %90 : vector<16xf32> to vector<16x1xf32>
    %cst_33 = arith.constant 3.200000e+01 : f32
    %92 = vector.broadcast %cst_33 : f32 to vector<16x1xf32>
    %93 = arith.divf %91, %92 : vector<16x1xf32>
    %94 = vector.broadcast %86 : vector<16x1xf32> to vector<16x32xf32>
    %95 = arith.subf %82, %94 : vector<16x32xf32>
    %cst_34 = arith.constant 9.99999974E-6 : f32
    %96 = vector.broadcast %cst_34 : f32 to vector<16x1xf32>
    %97 = arith.addf %93, %96 : vector<16x1xf32>
    %98 = math.rsqrt %97 : vector<16x1xf32>
    %99 = vector.broadcast %98 : vector<16x1xf32> to vector<16x32xf32>
    %100 = arith.mulf %95, %99 : vector<16x32xf32>
    %c0_35 = arith.constant 0 : index
    %c0_36 = arith.constant 0 : index
    %c0_37 = arith.constant 0 : index
    %101 = vector.load %arg7[%c0_35, %c0_36, %c0_37] : memref<2x1x32xf32, #tpu.memory_space<vmem>>, vector<1x1x32xf32>
    %102 = vector.shape_cast %101 : vector<1x1x32xf32> to vector<1x32xf32>
    %103 = vector.broadcast %102 : vector<1x32xf32> to vector<16x32xf32>
    %104 = arith.mulf %100, %103 : vector<16x32xf32>
    %c0_38 = arith.constant 0 : index
    %c0_39 = arith.constant 0 : index
    %c0_40 = arith.constant 0 : index
    %105 = vector.load %arg8[%c0_38, %c0_39, %c0_40] : memref<2x1x32xf32, #tpu.memory_space<vmem>>, vector<1x1x32xf32>
    %106 = vector.shape_cast %105 : vector<1x1x32xf32> to vector<1x32xf32>
    %107 = vector.broadcast %106 : vector<1x32xf32> to vector<16x32xf32>
    %108 = arith.addf %104, %107 : vector<16x32xf32>
    %109 = arith.truncf %108 : vector<16x32xf32> to vector<16x32xbf16>
    %c0_41 = arith.constant 0 : index
    %c0_42 = arith.constant 0 : index
    %c0_43 = arith.constant 0 : index
    %110 = vector.load %arg9[%c0_41, %c0_42, %c0_43] : memref<2x32x8xbf16, #tpu.memory_space<vmem>>, vector<1x32x8xbf16>
    %111 = vector.shape_cast %110 : vector<1x32x8xbf16> to vector<32x8xbf16>
    %cst_44 = arith.constant dense<0.000000e+00> : vector<16x8xf32>
    %112 = tpu.matmul %109, %111, %cst_44 {dimension_numbers = #tpu.dot_dimension_numbers<[1], [0], [0], [1], [0, 0, 1, 1], [], []>} : vector<16x32xbf16>, vector<32x8xbf16>, vector<16x8xf32> -> vector<16x8xf32>
    %c0_45 = arith.constant 0 : index
    %c0_46 = arith.constant 0 : index
    %c0_47 = arith.constant 0 : index
    %113 = vector.load %arg10[%c0_45, %c0_46, %c0_47] : memref<2x1x8xf32, #tpu.memory_space<vmem>>, vector<1x1x8xf32>
    %114 = vector.shape_cast %113 : vector<1x1x8xf32> to vector<1x8xf32>
    %115 = vector.broadcast %114 : vector<1x8xf32> to vector<16x8xf32>
    %116 = arith.addf %112, %115 : vector<16x8xf32>
    %cst_48 = arith.constant 0.000000e+00 : f32
    %117 = vector.broadcast %cst_48 : f32 to vector<16x8xf32>
    %118 = arith.maximumf %116, %117 : vector<16x8xf32>
    %119 = arith.truncf %118 : vector<16x8xf32> to vector<16x8xbf16>
    %c0_49 = arith.constant 0 : index
    %c0_50 = arith.constant 0 : index
    %c0_51 = arith.constant 0 : index
    %120 = vector.load %arg11[%c0_49, %c0_50, %c0_51] : memref<2x8x32xbf16, #tpu.memory_space<vmem>>, vector<1x8x32xbf16>
    %121 = vector.shape_cast %120 : vector<1x8x32xbf16> to vector<8x32xbf16>
    %cst_52 = arith.constant dense<0.000000e+00> : vector<16x32xf32>
    %122 = tpu.matmul %119, %121, %cst_52 {dimension_numbers = #tpu.dot_dimension_numbers<[1], [0], [0], [1], [0, 0, 1, 1], [], []>} : vector<16x8xbf16>, vector<8x32xbf16>, vector<16x32xf32> -> vector<16x32xf32>
    %c0_53 = arith.constant 0 : index
    %c0_54 = arith.constant 0 : index
    %c0_55 = arith.constant 0 : index
    %123 = vector.load %arg12[%c0_53, %c0_54, %c0_55] : memref<2x1x32xf32, #tpu.memory_space<vmem>>, vector<1x1x32xf32>
    %124 = vector.shape_cast %123 : vector<1x1x32xf32> to vector<1x32xf32>
    %125 = vector.broadcast %124 : vector<1x32xf32> to vector<16x32xf32>
    %126 = arith.addf %122, %125 : vector<16x32xf32>
    %127 = arith.addf %108, %126 : vector<16x32xf32>
    %cst_56 = arith.constant dense<0.000000e+00> : vector<16xf32>
    %128 = vector.multi_reduction <add>, %127, %cst_56 [1] : vector<16x32xf32> to vector<16xf32>
    %129 = vector.shape_cast %128 : vector<16xf32> to vector<16x1xf32>
    %cst_57 = arith.constant 3.200000e+01 : f32
    %130 = vector.broadcast %cst_57 : f32 to vector<16x1xf32>
    %131 = arith.divf %129, %130 : vector<16x1xf32>
    %132 = vector.broadcast %131 : vector<16x1xf32> to vector<16x32xf32>
    %133 = arith.subf %127, %132 : vector<16x32xf32>
    %134 = arith.mulf %133, %133 : vector<16x32xf32>
    %cst_58 = arith.constant dense<0.000000e+00> : vector<16xf32>
    %135 = vector.multi_reduction <add>, %134, %cst_58 [1] : vector<16x32xf32> to vector<16xf32>
    %136 = vector.shape_cast %135 : vector<16xf32> to vector<16x1xf32>
    %cst_59 = arith.constant 3.200000e+01 : f32
    %137 = vector.broadcast %cst_59 : f32 to vector<16x1xf32>
    %138 = arith.divf %136, %137 : vector<16x1xf32>
    %139 = vector.broadcast %131 : vector<16x1xf32> to vector<16x32xf32>
    %140 = arith.subf %127, %139 : vector<16x32xf32>
    %cst_60 = arith.constant 9.99999974E-6 : f32
    %141 = vector.broadcast %cst_60 : f32 to vector<16x1xf32>
    %142 = arith.addf %138, %141 : vector<16x1xf32>
    %143 = math.rsqrt %142 : vector<16x1xf32>
    %144 = vector.broadcast %143 : vector<16x1xf32> to vector<16x32xf32>
    %145 = arith.mulf %140, %144 : vector<16x32xf32>
    %c0_61 = arith.constant 0 : index
    %c0_62 = arith.constant 0 : index
    %c0_63 = arith.constant 0 : index
    %146 = vector.load %arg13[%c0_61, %c0_62, %c0_63] : memref<2x1x32xf32, #tpu.memory_space<vmem>>, vector<1x1x32xf32>
    %147 = vector.shape_cast %146 : vector<1x1x32xf32> to vector<1x32xf32>
    %148 = vector.broadcast %147 : vector<1x32xf32> to vector<16x32xf32>
    %149 = arith.mulf %145, %148 : vector<16x32xf32>
    %c0_64 = arith.constant 0 : index
    %c0_65 = arith.constant 0 : index
    %c0_66 = arith.constant 0 : index
    %150 = vector.load %arg14[%c0_64, %c0_65, %c0_66] : memref<2x1x32xf32, #tpu.memory_space<vmem>>, vector<1x1x32xf32>
    %151 = vector.shape_cast %150 : vector<1x1x32xf32> to vector<1x32xf32>
    %152 = vector.broadcast %151 : vector<1x32xf32> to vector<16x32xf32>
    %153 = arith.addf %149, %152 : vector<16x32xf32>
    %154 = arith.truncf %153 : vector<16x32xf32> to vector<16x32xbf16>
    %c1 = arith.constant 1 : index
    %c0_67 = arith.constant 0 : index
    %c0_68 = arith.constant 0 : index
    %155 = vector.load %arg3[%c1, %c0_67, %c0_68] : memref<2x32x96xbf16, #tpu.memory_space<vmem>>, vector<1x32x96xbf16>
    %156 = vector.shape_cast %155 : vector<1x32x96xbf16> to vector<32x96xbf16>
    %cst_69 = arith.constant dense<0.000000e+00> : vector<16x96xf32>
    %157 = tpu.matmul %154, %156, %cst_69 {dimension_numbers = #tpu.dot_dimension_numbers<[1], [0], [0], [1], [0, 0, 1, 1], [], []>} : vector<16x32xbf16>, vector<32x96xbf16>, vector<16x96xf32> -> vector<16x96xf32>
    %c1_70 = arith.constant 1 : index
    %c0_71 = arith.constant 0 : index
    %c0_72 = arith.constant 0 : index
    %158 = vector.load %arg4[%c1_70, %c0_71, %c0_72] : memref<2x1x96xf32, #tpu.memory_space<vmem>>, vector<1x1x96xf32>
    %159 = vector.shape_cast %158 : vector<1x1x96xf32> to vector<1x96xf32>
    %160 = vector.broadcast %159 : vector<1x96xf32> to vector<16x96xf32>
    %161 = arith.addf %157, %160 : vector<16x96xf32>
    %162 = vector.extract_strided_slice %161 {offsets = [0, 0], sizes = [16, 16], strides = [1, 1]} : vector<16x96xf32> to vector<16x16xf32>
    %163 = vector.shape_cast %162 : vector<16x16xf32> to vector<2x8x16xf32>
    %cst_73 = arith.constant 2.500000e-01 : f32
    %164 = vector.broadcast %cst_73 : f32 to vector<2x8x16xf32>
    %165 = arith.mulf %163, %164 : vector<2x8x16xf32>
    %166 = vector.extract_strided_slice %161 {offsets = [0, 32], sizes = [16, 16], strides = [1, 1]} : vector<16x96xf32> to vector<16x16xf32>
    %167 = vector.shape_cast %166 : vector<16x16xf32> to vector<2x8x16xf32>
    %168 = vector.extract_strided_slice %161 {offsets = [0, 64], sizes = [16, 16], strides = [1, 1]} : vector<16x96xf32> to vector<16x16xf32>
    %169 = vector.shape_cast %168 : vector<16x16xf32> to vector<2x8x16xf32>
    %170 = arith.truncf %165 : vector<2x8x16xf32> to vector<2x8x16xbf16>
    %171 = arith.truncf %167 : vector<2x8x16xf32> to vector<2x8x16xbf16>
    "tpu.trace_start"() <{level = 10 : i32, message = "bqd,bkd->bqk"}> : () -> ()
    %cst_74 = arith.constant dense<0.000000e+00> : vector<2x8x8xf32>
    %172 = tpu.matmul %170, %171, %cst_74 {dimension_numbers = #tpu.dot_dimension_numbers<[2], [2], [1], [1], [0, 0, 0, 1, 1, 1], [0], [0]>} : vector<2x8x16xbf16>, vector<2x8x16xbf16>, vector<2x8x8xf32> -> vector<2x8x8xf32>
    "tpu.trace_stop"() : () -> ()
    %173 = arith.addf %172, %13 : vector<2x8x8xf32>
    %cst_75 = arith.constant dense<0xFF800000> : vector<2x8xf32>
    %174 = vector.multi_reduction <maximumf>, %173, %cst_75 [2] : vector<2x8x8xf32> to vector<2x8xf32>
    %175 = vector.shape_cast %174 : vector<2x8xf32> to vector<2x8x1xf32>
    %176 = vector.broadcast %175 : vector<2x8x1xf32> to vector<2x8x8xf32>
    %177 = arith.subf %173, %176 : vector<2x8x8xf32>
    %178 = math.exp %177 : vector<2x8x8xf32>
    %cst_76 = arith.constant dense<0.000000e+00> : vector<2x8xf32>
    %179 = vector.multi_reduction <add>, %178, %cst_76 [2] : vector<2x8x8xf32> to vector<2x8xf32>
    %180 = vector.shape_cast %179 : vector<2x8xf32> to vector<2x8x1xf32>
    %181 = arith.truncf %178 : vector<2x8x8xf32> to vector<2x8x8xbf16>
    %182 = arith.truncf %169 : vector<2x8x16xf32> to vector<2x8x16xbf16>
    "tpu.trace_start"() <{level = 10 : i32, message = "bqk,bkd->bqd"}> : () -> ()
    %cst_77 = arith.constant dense<0.000000e+00> : vector<2x8x16xf32>
    %183 = tpu.matmul %181, %182, %cst_77 {dimension_numbers = #tpu.dot_dimension_numbers<[2], [1], [1], [2], [0, 0, 0, 1, 1, 2], [0], [0]>} : vector<2x8x8xbf16>, vector<2x8x16xbf16>, vector<2x8x16xf32> -> vector<2x8x16xf32>
    "tpu.trace_stop"() : () -> ()
    %184 = tpu.reciprocal %180 {approx = true} : vector<2x8x1xf32> -> vector<2x8x1xf32>
    %185 = vector.broadcast %184 : vector<2x8x1xf32> to vector<2x8x16xf32>
    %186 = arith.mulf %183, %185 : vector<2x8x16xf32>
    %187 = vector.extract_strided_slice %161 {offsets = [0, 16], sizes = [16, 16], strides = [1, 1]} : vector<16x96xf32> to vector<16x16xf32>
    %188 = vector.shape_cast %187 : vector<16x16xf32> to vector<2x8x16xf32>
    %cst_78 = arith.constant 2.500000e-01 : f32
    %189 = vector.broadcast %cst_78 : f32 to vector<2x8x16xf32>
    %190 = arith.mulf %188, %189 : vector<2x8x16xf32>
    %191 = vector.extract_strided_slice %161 {offsets = [0, 48], sizes = [16, 16], strides = [1, 1]} : vector<16x96xf32> to vector<16x16xf32>
    %192 = vector.shape_cast %191 : vector<16x16xf32> to vector<2x8x16xf32>
    %193 = vector.extract_strided_slice %161 {offsets = [0, 80], sizes = [16, 16], strides = [1, 1]} : vector<16x96xf32> to vector<16x16xf32>
    %194 = vector.shape_cast %193 : vector<16x16xf32> to vector<2x8x16xf32>
    %195 = arith.truncf %190 : vector<2x8x16xf32> to vector<2x8x16xbf16>
    %196 = arith.truncf %192 : vector<2x8x16xf32> to vector<2x8x16xbf16>
    "tpu.trace_start"() <{level = 10 : i32, message = "bqd,bkd->bqk"}> : () -> ()
    %cst_79 = arith.constant dense<0.000000e+00> : vector<2x8x8xf32>
    %197 = tpu.matmul %195, %196, %cst_79 {dimension_numbers = #tpu.dot_dimension_numbers<[2], [2], [1], [1], [0, 0, 0, 1, 1, 1], [0], [0]>} : vector<2x8x16xbf16>, vector<2x8x16xbf16>, vector<2x8x8xf32> -> vector<2x8x8xf32>
    "tpu.trace_stop"() : () -> ()
    %198 = arith.addf %197, %13 : vector<2x8x8xf32>
    %cst_80 = arith.constant dense<0xFF800000> : vector<2x8xf32>
    %199 = vector.multi_reduction <maximumf>, %198, %cst_80 [2] : vector<2x8x8xf32> to vector<2x8xf32>
    %200 = vector.shape_cast %199 : vector<2x8xf32> to vector<2x8x1xf32>
    %201 = vector.broadcast %200 : vector<2x8x1xf32> to vector<2x8x8xf32>
    %202 = arith.subf %198, %201 : vector<2x8x8xf32>
    %203 = math.exp %202 : vector<2x8x8xf32>
    %cst_81 = arith.constant dense<0.000000e+00> : vector<2x8xf32>
    %204 = vector.multi_reduction <add>, %203, %cst_81 [2] : vector<2x8x8xf32> to vector<2x8xf32>
    %205 = vector.shape_cast %204 : vector<2x8xf32> to vector<2x8x1xf32>
    %206 = arith.truncf %203 : vector<2x8x8xf32> to vector<2x8x8xbf16>
    %207 = arith.truncf %194 : vector<2x8x16xf32> to vector<2x8x16xbf16>
    "tpu.trace_start"() <{level = 10 : i32, message = "bqk,bkd->bqd"}> : () -> ()
    %cst_82 = arith.constant dense<0.000000e+00> : vector<2x8x16xf32>
    %208 = tpu.matmul %206, %207, %cst_82 {dimension_numbers = #tpu.dot_dimension_numbers<[2], [1], [1], [2], [0, 0, 0, 1, 1, 2], [0], [0]>} : vector<2x8x8xbf16>, vector<2x8x16xbf16>, vector<2x8x16xf32> -> vector<2x8x16xf32>
    "tpu.trace_stop"() : () -> ()
    %209 = tpu.reciprocal %205 {approx = true} : vector<2x8x1xf32> -> vector<2x8x1xf32>
    %210 = vector.broadcast %209 : vector<2x8x1xf32> to vector<2x8x16xf32>
    %211 = arith.mulf %208, %210 : vector<2x8x16xf32>
    %212 = tpu.concatenate %186, %211 in 2 : vector<2x8x16xf32>, vector<2x8x16xf32> -> vector<2x8x32xf32>
    %213 = vector.shape_cast %212 : vector<2x8x32xf32> to vector<16x32xf32>
    %214 = arith.truncf %213 : vector<16x32xf32> to vector<16x32xbf16>
    %c1_83 = arith.constant 1 : index
    %c0_84 = arith.constant 0 : index
    %c0_85 = arith.constant 0 : index
    %215 = vector.load %arg5[%c1_83, %c0_84, %c0_85] : memref<2x32x32xbf16, #tpu.memory_space<vmem>>, vector<1x32x32xbf16>
    %216 = vector.shape_cast %215 : vector<1x32x32xbf16> to vector<32x32xbf16>
    %cst_86 = arith.constant dense<0.000000e+00> : vector<16x32xf32>
    %217 = tpu.matmul %214, %216, %cst_86 {dimension_numbers = #tpu.dot_dimension_numbers<[1], [0], [0], [1], [0, 0, 1, 1], [], []>} : vector<16x32xbf16>, vector<32x32xbf16>, vector<16x32xf32> -> vector<16x32xf32>
    %c1_87 = arith.constant 1 : index
    %c0_88 = arith.constant 0 : index
    %c0_89 = arith.constant 0 : index
    %218 = vector.load %arg6[%c1_87, %c0_88, %c0_89] : memref<2x1x32xf32, #tpu.memory_space<vmem>>, vector<1x1x32xf32>
    %219 = vector.shape_cast %218 : vector<1x1x32xf32> to vector<1x32xf32>
    %220 = vector.broadcast %219 : vector<1x32xf32> to vector<16x32xf32>
    %221 = arith.addf %217, %220 : vector<16x32xf32>
    %222 = arith.addf %153, %221 : vector<16x32xf32>
    %cst_90 = arith.constant dense<0.000000e+00> : vector<16xf32>
    %223 = vector.multi_reduction <add>, %222, %cst_90 [1] : vector<16x32xf32> to vector<16xf32>
    %224 = vector.shape_cast %223 : vector<16xf32> to vector<16x1xf32>
    %cst_91 = arith.constant 3.200000e+01 : f32
    %225 = vector.broadcast %cst_91 : f32 to vector<16x1xf32>
    %226 = arith.divf %224, %225 : vector<16x1xf32>
    %227 = vector.broadcast %226 : vector<16x1xf32> to vector<16x32xf32>
    %228 = arith.subf %222, %227 : vector<16x32xf32>
    %229 = arith.mulf %228, %228 : vector<16x32xf32>
    %cst_92 = arith.constant dense<0.000000e+00> : vector<16xf32>
    %230 = vector.multi_reduction <add>, %229, %cst_92 [1] : vector<16x32xf32> to vector<16xf32>
    %231 = vector.shape_cast %230 : vector<16xf32> to vector<16x1xf32>
    %cst_93 = arith.constant 3.200000e+01 : f32
    %232 = vector.broadcast %cst_93 : f32 to vector<16x1xf32>
    %233 = arith.divf %231, %232 : vector<16x1xf32>
    %234 = vector.broadcast %226 : vector<16x1xf32> to vector<16x32xf32>
    %235 = arith.subf %222, %234 : vector<16x32xf32>
    %cst_94 = arith.constant 9.99999974E-6 : f32
    %236 = vector.broadcast %cst_94 : f32 to vector<16x1xf32>
    %237 = arith.addf %233, %236 : vector<16x1xf32>
    %238 = math.rsqrt %237 : vector<16x1xf32>
    %239 = vector.broadcast %238 : vector<16x1xf32> to vector<16x32xf32>
    %240 = arith.mulf %235, %239 : vector<16x32xf32>
    %c1_95 = arith.constant 1 : index
    %c0_96 = arith.constant 0 : index
    %c0_97 = arith.constant 0 : index
    %241 = vector.load %arg7[%c1_95, %c0_96, %c0_97] : memref<2x1x32xf32, #tpu.memory_space<vmem>>, vector<1x1x32xf32>
    %242 = vector.shape_cast %241 : vector<1x1x32xf32> to vector<1x32xf32>
    %243 = vector.broadcast %242 : vector<1x32xf32> to vector<16x32xf32>
    %244 = arith.mulf %240, %243 : vector<16x32xf32>
    %c1_98 = arith.constant 1 : index
    %c0_99 = arith.constant 0 : index
    %c0_100 = arith.constant 0 : index
    %245 = vector.load %arg8[%c1_98, %c0_99, %c0_100] : memref<2x1x32xf32, #tpu.memory_space<vmem>>, vector<1x1x32xf32>
    %246 = vector.shape_cast %245 : vector<1x1x32xf32> to vector<1x32xf32>
    %247 = vector.broadcast %246 : vector<1x32xf32> to vector<16x32xf32>
    %248 = arith.addf %244, %247 : vector<16x32xf32>
    %249 = arith.truncf %248 : vector<16x32xf32> to vector<16x32xbf16>
    %c1_101 = arith.constant 1 : index
    %c0_102 = arith.constant 0 : index
    %c0_103 = arith.constant 0 : index
    %250 = vector.load %arg9[%c1_101, %c0_102, %c0_103] : memref<2x32x8xbf16, #tpu.memory_space<vmem>>, vector<1x32x8xbf16>
    %251 = vector.shape_cast %250 : vector<1x32x8xbf16> to vector<32x8xbf16>
    %cst_104 = arith.constant dense<0.000000e+00> : vector<16x8xf32>
    %252 = tpu.matmul %249, %251, %cst_104 {dimension_numbers = #tpu.dot_dimension_numbers<[1], [0], [0], [1], [0, 0, 1, 1], [], []>} : vector<16x32xbf16>, vector<32x8xbf16>, vector<16x8xf32> -> vector<16x8xf32>
    %c1_105 = arith.constant 1 : index
    %c0_106 = arith.constant 0 : index
    %c0_107 = arith.constant 0 : index
    %253 = vector.load %arg10[%c1_105, %c0_106, %c0_107] : memref<2x1x8xf32, #tpu.memory_space<vmem>>, vector<1x1x8xf32>
    %254 = vector.shape_cast %253 : vector<1x1x8xf32> to vector<1x8xf32>
    %255 = vector.broadcast %254 : vector<1x8xf32> to vector<16x8xf32>
    %256 = arith.addf %252, %255 : vector<16x8xf32>
    %cst_108 = arith.constant 0.000000e+00 : f32
    %257 = vector.broadcast %cst_108 : f32 to vector<16x8xf32>
    %258 = arith.maximumf %256, %257 : vector<16x8xf32>
    %259 = arith.truncf %258 : vector<16x8xf32> to vector<16x8xbf16>
    %c1_109 = arith.constant 1 : index
    %c0_110 = arith.constant 0 : index
    %c0_111 = arith.constant 0 : index
    %260 = vector.load %arg11[%c1_109, %c0_110, %c0_111] : memref<2x8x32xbf16, #tpu.memory_space<vmem>>, vector<1x8x32xbf16>
    %261 = vector.shape_cast %260 : vector<1x8x32xbf16> to vector<8x32xbf16>
    %cst_112 = arith.constant dense<0.000000e+00> : vector<16x32xf32>
    %262 = tpu.matmul %259, %261, %cst_112 {dimension_numbers = #tpu.dot_dimension_numbers<[1], [0], [0], [1], [0, 0, 1, 1], [], []>} : vector<16x8xbf16>, vector<8x32xbf16>, vector<16x32xf32> -> vector<16x32xf32>
    %c1_113 = arith.constant 1 : index
    %c0_114 = arith.constant 0 : index
    %c0_115 = arith.constant 0 : index
    %263 = vector.load %arg12[%c1_113, %c0_114, %c0_115] : memref<2x1x32xf32, #tpu.memory_space<vmem>>, vector<1x1x32xf32>
    %264 = vector.shape_cast %263 : vector<1x1x32xf32> to vector<1x32xf32>
    %265 = vector.broadcast %264 : vector<1x32xf32> to vector<16x32xf32>
    %266 = arith.addf %262, %265 : vector<16x32xf32>
    %267 = arith.addf %248, %266 : vector<16x32xf32>
    %cst_116 = arith.constant dense<0.000000e+00> : vector<16xf32>
    %268 = vector.multi_reduction <add>, %267, %cst_116 [1] : vector<16x32xf32> to vector<16xf32>
    %269 = vector.shape_cast %268 : vector<16xf32> to vector<16x1xf32>
    %cst_117 = arith.constant 3.200000e+01 : f32
    %270 = vector.broadcast %cst_117 : f32 to vector<16x1xf32>
    %271 = arith.divf %269, %270 : vector<16x1xf32>
    %272 = vector.broadcast %271 : vector<16x1xf32> to vector<16x32xf32>
    %273 = arith.subf %267, %272 : vector<16x32xf32>
    %274 = arith.mulf %273, %273 : vector<16x32xf32>
    %cst_118 = arith.constant dense<0.000000e+00> : vector<16xf32>
    %275 = vector.multi_reduction <add>, %274, %cst_118 [1] : vector<16x32xf32> to vector<16xf32>
    %276 = vector.shape_cast %275 : vector<16xf32> to vector<16x1xf32>
    %cst_119 = arith.constant 3.200000e+01 : f32
    %277 = vector.broadcast %cst_119 : f32 to vector<16x1xf32>
    %278 = arith.divf %276, %277 : vector<16x1xf32>
    %279 = vector.broadcast %271 : vector<16x1xf32> to vector<16x32xf32>
    %280 = arith.subf %267, %279 : vector<16x32xf32>
    %cst_120 = arith.constant 9.99999974E-6 : f32
    %281 = vector.broadcast %cst_120 : f32 to vector<16x1xf32>
    %282 = arith.addf %278, %281 : vector<16x1xf32>
    %283 = math.rsqrt %282 : vector<16x1xf32>
    %284 = vector.broadcast %283 : vector<16x1xf32> to vector<16x32xf32>
    %285 = arith.mulf %280, %284 : vector<16x32xf32>
    %c1_121 = arith.constant 1 : index
    %c0_122 = arith.constant 0 : index
    %c0_123 = arith.constant 0 : index
    %286 = vector.load %arg13[%c1_121, %c0_122, %c0_123] : memref<2x1x32xf32, #tpu.memory_space<vmem>>, vector<1x1x32xf32>
    %287 = vector.shape_cast %286 : vector<1x1x32xf32> to vector<1x32xf32>
    %288 = vector.broadcast %287 : vector<1x32xf32> to vector<16x32xf32>
    %289 = arith.mulf %285, %288 : vector<16x32xf32>
    %c1_124 = arith.constant 1 : index
    %c0_125 = arith.constant 0 : index
    %c0_126 = arith.constant 0 : index
    %290 = vector.load %arg14[%c1_124, %c0_125, %c0_126] : memref<2x1x32xf32, #tpu.memory_space<vmem>>, vector<1x1x32xf32>
    %291 = vector.shape_cast %290 : vector<1x1x32xf32> to vector<1x32xf32>
    %292 = vector.broadcast %291 : vector<1x32xf32> to vector<16x32xf32>
    %293 = arith.addf %289, %292 : vector<16x32xf32>
    %c0_127 = arith.constant 0 : index
    %c0_128 = arith.constant 0 : index
    %294 = vector.load %arg15[%c0_127, %c0_128] : memref<1x32xf32, #tpu.memory_space<vmem>>, vector<1x32xf32>
    %295 = vector.broadcast %294 : vector<1x32xf32> to vector<16x32xf32>
    %296 = arith.mulf %293, %295 : vector<16x32xf32>
    %cst_129 = arith.constant dense<0.000000e+00> : vector<16xf32>
    %297 = vector.multi_reduction <add>, %296, %cst_129 [1] : vector<16x32xf32> to vector<16xf32>
    %298 = vector.shape_cast %297 : vector<16xf32> to vector<16x1xf32>
    %c0_130 = arith.constant 0 : index
    %c0_131 = arith.constant 0 : index
    %299 = vector.load %arg16[%c0_130, %c0_131] : memref<1x1xf32, #tpu.memory_space<vmem>>, vector<1x1xf32>
    %300 = vector.extract %299[0, 0] : f32 from vector<1x1xf32>
    %301 = vector.broadcast %300 : f32 to vector<16x1xf32>
    %302 = arith.addf %298, %301 : vector<16x1xf32>
    %303 = vector.shape_cast %302 : vector<16x1xf32> to vector<2x8x1xf32>
    %c0_132 = arith.constant 0 : index
    %c0_133 = arith.constant 0 : index
    %c0_134 = arith.constant 0 : index
    %304 = vector.load %arg17[%c0_132, %c0_133, %c0_134] : memref<2x8x1xf32, #tpu.memory_space<vmem>>, vector<2x8x1xf32>
    tpu.vector_store %arg17[%c0_132, %c0_133, %c0_134], %303 {strides = array<i32>} : memref<2x8x1xf32, #tpu.memory_space<vmem>>, vector<2x8x1xf32>,
    return
  }
  func.func @transform_0(%arg0: i32) -> (i32, i32, i32) {
    %c0_i32 = arith.constant 0 : i32
    %c0_i32_0 = arith.constant 0 : i32
    %c0_i32_1 = arith.constant 0 : i32
    return %arg0, %c0_i32, %c0_i32_0 : i32, i32, i32
  }
  func.func @transform_1(%arg0: i32) -> (i32, i32) {
    %c0_i32 = arith.constant 0 : i32
    %c0_i32_0 = arith.constant 0 : i32
    return %arg0, %c0_i32 : i32, i32
  }
  func.func @transform_2(%arg0: i32) -> (i32, i32, i32) {
    %c0_i32 = arith.constant 0 : i32
    %c0_i32_0 = arith.constant 0 : i32
    %c0_i32_1 = arith.constant 0 : i32
    %c0_i32_2 = arith.constant 0 : i32
    return %c0_i32, %c0_i32_0, %c0_i32_1 : i32, i32, i32
  }
  func.func @transform_3(%arg0: i32) -> (i32, i32, i32) {
    %c0_i32 = arith.constant 0 : i32
    %c0_i32_0 = arith.constant 0 : i32
    %c0_i32_1 = arith.constant 0 : i32
    %c0_i32_2 = arith.constant 0 : i32
    return %c0_i32, %c0_i32_0, %c0_i32_1 : i32, i32, i32
  }
  func.func @transform_4(%arg0: i32) -> (i32, i32, i32) {
    %c0_i32 = arith.constant 0 : i32
    %c0_i32_0 = arith.constant 0 : i32
    %c0_i32_1 = arith.constant 0 : i32
    %c0_i32_2 = arith.constant 0 : i32
    return %c0_i32, %c0_i32_0, %c0_i32_1 : i32, i32, i32
  }
  func.func @transform_5(%arg0: i32) -> (i32, i32, i32) {
    %c0_i32 = arith.constant 0 : i32
    %c0_i32_0 = arith.constant 0 : i32
    %c0_i32_1 = arith.constant 0 : i32
    %c0_i32_2 = arith.constant 0 : i32
    return %c0_i32, %c0_i32_0, %c0_i32_1 : i32, i32, i32
  }
  func.func @transform_6(%arg0: i32) -> (i32, i32, i32) {
    %c0_i32 = arith.constant 0 : i32
    %c0_i32_0 = arith.constant 0 : i32
    %c0_i32_1 = arith.constant 0 : i32
    %c0_i32_2 = arith.constant 0 : i32
    return %c0_i32, %c0_i32_0, %c0_i32_1 : i32, i32, i32
  }
  func.func @transform_7(%arg0: i32) -> (i32, i32, i32) {
    %c0_i32 = arith.constant 0 : i32
    %c0_i32_0 = arith.constant 0 : i32
    %c0_i32_1 = arith.constant 0 : i32
    %c0_i32_2 = arith.constant 0 : i32
    return %c0_i32, %c0_i32_0, %c0_i32_1 : i32, i32, i32
  }
  func.func @transform_8(%arg0: i32) -> (i32, i32, i32) {
    %c0_i32 = arith.constant 0 : i32
    %c0_i32_0 = arith.constant 0 : i32
    %c0_i32_1 = arith.constant 0 : i32
    %c0_i32_2 = arith.constant 0 : i32
    return %c0_i32, %c0_i32_0, %c0_i32_1 : i32, i32, i32
  }
  func.func @transform_9(%arg0: i32) -> (i32, i32, i32) {
    %c0_i32 = arith.constant 0 : i32
    %c0_i32_0 = arith.constant 0 : i32
    %c0_i32_1 = arith.constant 0 : i32
    %c0_i32_2 = arith.constant 0 : i32
    return %c0_i32, %c0_i32_0, %c0_i32_1 : i32, i32, i32
  }
  func.func @transform_10(%arg0: i32) -> (i32, i32, i32) {
    %c0_i32 = arith.constant 0 : i32
    %c0_i32_0 = arith.constant 0 : i32
    %c0_i32_1 = arith.constant 0 : i32
    %c0_i32_2 = arith.constant 0 : i32
    return %c0_i32, %c0_i32_0, %c0_i32_1 : i32, i32, i32
  }
  func.func @transform_11(%arg0: i32) -> (i32, i32, i32) {
    %c0_i32 = arith.constant 0 : i32
    %c0_i32_0 = arith.constant 0 : i32
    %c0_i32_1 = arith.constant 0 : i32
    %c0_i32_2 = arith.constant 0 : i32
    return %c0_i32, %c0_i32_0, %c0_i32_1 : i32, i32, i32
  }
  func.func @transform_12(%arg0: i32) -> (i32, i32, i32) {
    %c0_i32 = arith.constant 0 : i32
    %c0_i32_0 = arith.constant 0 : i32
    %c0_i32_1 = arith.constant 0 : i32
    %c0_i32_2 = arith.constant 0 : i32
    return %c0_i32, %c0_i32_0, %c0_i32_1 : i32, i32, i32
  }
  func.func @transform_13(%arg0: i32) -> (i32, i32, i32) {
    %c0_i32 = arith.constant 0 : i32
    %c0_i32_0 = arith.constant 0 : i32
    %c0_i32_1 = arith.constant 0 : i32
    %c0_i32_2 = arith.constant 0 : i32
    return %c0_i32, %c0_i32_0, %c0_i32_1 : i32, i32, i32
  }
  func.func @transform_14(%arg0: i32) -> (i32, i32) {
    %c0_i32 = arith.constant 0 : i32
    %c0_i32_0 = arith.constant 0 : i32
    %c0_i32_1 = arith.constant 0 : i32
    return %c0_i32, %c0_i32_0 : i32, i32
  }
  func.func @transform_15(%arg0: i32) -> (i32, i32) {
    %c0_i32 = arith.constant 0 : i32
    %c0_i32_0 = arith.constant 0 : i32
    %c0_i32_1 = arith.constant 0 : i32
    return %c0_i32, %c0_i32_0 : i32, i32
  }
  func.func @transform_16(%arg0: i32) -> (i32, i32, i32) {
    %c0_i32 = arith.constant 0 : i32
    %c0_i32_0 = arith.constant 0 : i32
    %c0_i32_1 = arith.constant 0 : i32
    return %arg0, %c0_i32, %c0_i32_0 : i32, i32, i32
  }
}

</mosaic_0001>

<bundles_post_ra>
// kernel: tpu_custom_call.1
= control target key start
LH: loop header
LB: loop body
LE: loop exit
PB: predicated region body
PF: predicated region fallthrough
CT: control target
= control target key end

     0   :  { %s2715_s0 = inlined_call_operand.hbm [shape: f32[2,8,32], index: 0, kind: input, shape index: {}]   ;;  %s2716_s1 = inlined_call_operand.vmem [shape: f32[2,8], index: 1, kind: input, shape index: {}]   ;;  %s2717_s2 = inlined_call_operand.vmem [shape: bf16[2,32,96], index: 2, kind: input, shape index: {}]   ;;  %s2718_s3 = inlined_call_operand.vmem [shape: f32[2,1,96], index: 3, kind: input, shape index: {}]   ;;  %s2719_s4 = inlined_call_operand.hbm [shape: bf16[2,32,32], index: 4, kind: input, shape index: {}]   ;;  %s2720_s5 = inlined_call_operand.vmem [shape: f32[2,1,32], index: 5, kind: input, shape index: {}]   ;;  %s2721_s6 = inlined_call_operand.vmem [shape: f32[2,1,32], index: 6, kind: input, shape index: {}]   ;;  %s2722_s7 = inlined_call_operand.hbm [shape: f32[2,1,32], index: 7, kind: input, shape index: {}]   ;;  %s2723_s8 = inlined_call_operand.vmem [shape: bf16[2,32,8], index: 8, kind: input, shape index: {}]   ;;  %s2724_s9 = inlined_call_operand.vmem [shape: f32[2,1,8], index: 9, kind: input, shape index: {}]   ;;  %s2725_s10 = inlined_call_operand.vmem [shape: bf16[2,8,32], index: 10, kind: input, shape index: {}]   ;;  %s2726_s11 = inlined_call_operand.vmem [shape: f32[2,1,32], index: 11, kind: input, shape index: {}]   ;;  %s2727_s12 = inlined_call_operand.vmem [shape: f32[2,1,32], index: 12, kind: input, shape index: {}]   ;;  %s2728_s13 = inlined_call_operand.vmem [shape: f32[2,1,32], index: 13, kind: input, shape index: {}]   ;;  %s2729_s14 = inlined_call_operand.vmem [shape: f32[1,32], index: 14, kind: input, shape index: {}]   ;;  %s2730_s15 = inlined_call_operand.<no memory space> [shape: f32[1,1], index: 15, kind: input, shape index: {}]   ;;  %s2731_s16 = inlined_call_operand.vmem [shape: f32[2,8,1], index: 16, kind: output, shape index: {}]  }
   0x1   :  { %2732 = sst [smem:[#allocation10_spill]] %s2715_s0  ;;  %v21_v0 = vstv %s2730_s15 }
   0x2   :  { %22 = vst [vmem:[#allocation2] sm:$0x1] %v21_v0 }
   0x3   :  { %23 = vsyncpa [#allocation4], 0 }
   0x4   :  { %24 = vsyncpa [#allocation6], 0  ;;  %s2247_s23 = smov [#allocation5]  }
   0x5   :  { %s48_s24 = sshll.u32 %s2247_s23, 4  ;;  %s49_s24 = int_to_ptr.vmem [resolvable:$true] %s48_s24 }
   0x6   :  { %s2191_s25 = scalar_lea.vmem %s49_s24, 512  ;;  %p2196_p1 = scmp.lt.s32.totalorder %s49_s24, %s49_s24 }
   0x7   :  { %p2192_p0 = scmp.ne.s32.totalorder %s49_s24, %s2191_s25  ;;  %p2197_p2 = scmp.lt.s32.totalorder %s2191_s25, %s2191_s25 }
   0x9   :  { %p2198_p3 = por %p2197_p2, %p2196_p1 }
   0xb   :  { %p2199_p4 = pnand %p2198_p3, %p2192_p0 }
   0xd   :  { %2202 = shalt.err (!%p2199_p4)
}
   0xe   :  { %s2248_s26 = smov 64   ;;  %s2249_s27 = smov 4  }
   0xf   :  { %54 = dma.hbm_to_vmem [thread:$0]  %s2719_s4, 512, %s49_s24, [#allocation6], %s2248_s26, %s2248_s26, %s2249_s27  }
  0x10   :  { %s2250_s15 = smov [#allocation3]  }
  0x11   :  { %s30_s30 = sshll.u32 %s2250_s15, 4  ;;  %s31_s30 = int_to_ptr.vmem [resolvable:$true] %s30_s30 }
  0x12   :  { %s2211_s0 = scalar_lea.vmem %s31_s30, 256  ;;  %p2216_p6 = scmp.lt.s32.totalorder %s31_s30, %s31_s30 }
  0x13   :  { %p2212_p5 = scmp.ne.s32.totalorder %s31_s30, %s2211_s0  ;;  %p2217_p7 = scmp.lt.s32.totalorder %s2211_s0, %s2211_s0 }
  0x15   :  { %p2218_p8 = por %p2217_p7, %p2216_p6 }
  0x17   :  { %p2219_p9 = pnand %p2218_p8, %p2212_p5 }
  0x19   :  { %2222 = shalt.err (!%p2219_p9)
}
  0x1a   :  { %s2251_s17 = smov 128   ;;  %s2252_s18 = smov 8  }
  0x1b   :  { %s2733_s21 = sld [smem:[#allocation10_spill]]  ;;  %s2253_s22 = smov [#allocation7]  }
  0x1c   :  { %s64_s23 = sshll.u32 %s2253_s22, 4  ;;  %s65_s23 = int_to_ptr.vmem [resolvable:$true] %s64_s23 }
  0x1d   :  { %s2231_s4 = scalar_lea.vmem %s65_s23, 32  ;;  %p2236_p11 = scmp.lt.s32.totalorder %s65_s23, %s65_s23 }
  0x1e   :  { %p2232_p10 = scmp.ne.s32.totalorder %s65_s23, %s2231_s4  ;;  %p2237_p12 = scmp.lt.s32.totalorder %s2231_s4, %s2231_s4 }
  0x20   :  { %p2238_p13 = por %p2237_p12, %p2236_p11 }
  0x21   :  { %36 = dma.hbm_to_vmem [thread:$0]  %s2733_s21, 256, %s31_s30, [#allocation4], %s2251_s17, %s2251_s17, %s2252_s18  }
  0x22   :  { %p2239_p0 = pnand %p2238_p13, %p2232_p10 }
  0x24   :  { %2242 = shalt.err (!%p2239_p0)
}
  0x25   :  { %s2254_s24 = smov 16   ;;  %s2255_s25 = smov 1  }
  0x26   :  { %70 = dma.hbm_to_vmem [thread:$0]  %s2722_s7, 32, %s65_s23, [#allocation6], %s2254_s24, %s2254_s24, %s2255_s25  }
  0x27   :  { %2243 = dma.done.wait [#allocation4], 256  }
  0x28   :  { %2244 = vsyncadd [#allocation4], 4294967040 }
  0x29   :  { %2245 = dma.done.wait [#allocation6], 544  }
  0x2a   :  { %2246 = vsyncadd [#allocation6], 4294966752  ;;  %v2256_v1 = vmov 0.0   ;;  %vm2257_vm0 = vmmov 0   ;;  %v2123_v2 = vld [vmem:[%s2717_s2 + $0x8] sm:$0xff]   ;;  %v2124_v3 = vld [vmem:[%s2717_s2] sm:$0xff]   ;;  %v99_v26 = vlaneseq }
  0x2b   :  { %1938 = vmatprep.subr.bf16.mxu0 %v2256_v1  ;;  %1942 = vmatprep.mubr.msk.bf16.mxu0 %vm2257_vm0, %v2256_v1  ;;  %v2377_v4 = vld [vmem:[#allocation3] sm:$0xff]  ;;  %v2379_v5 = vld [vmem:[#allocation3 + $0x8] sm:$0xff]  ;;  %vm172_vm1 = vcmask 261120   ;;  %v1815_v7 = vld [vmem:[%s2718_s3] ss:$0 sm:$0xff]  ;;  %s2258_s18 = smov 96  }
  0x2c   :  { %1946 = vmatprep.subr.bf16.mxu1 %v2256_v1  ;;  %1948 = vmatprep.mubr.msk.bf16.mxu1 %vm2257_vm0, %v2256_v1  ;;  %v148_v6 = vpack.c.bf16 %v2379_v5, %v2377_v4  ;;  %s2259_s19 = smov 80   ;;  %s2260_s20 = smov 112   ;;  %vm226_vm2 = vcmask 130048   ;;  %vm348_vm3 = vcmask 1043456   ;;  %v2261_v27 = vmov 1966171168  }
  0x2d   :  { %1939 = vmatpush3.bf16.msra.mxu0 %v2123_v2  ;;  %v115_v28 = vunpack.c.l.s4 %v2261_v27  ;;  %v100_v29 = vshrl.u32 %v99_v26, 7  ;;  %v1814_v32 = vld.sshfl [vmem:[%s2716_s1] sm:$0x11 pattern:$0x75316420]  ;;  %v2262_v37 = vmov 0  }
  0x2e   :  { %1940 = vmatprep.subr.bf16.mxu0 %v2256_v1  ;;  %v113_v34 = vcombine.high %v1814_v32, %v1814_v32  ;;  %v102_v39 = vand.u32 127, %v99_v26  ;;  %vm322_vm11 = vcmask 64512   ;;  %s2263_s1 = smov 48   ;;  %vm1805_vm12 = vcmask 7168  }
  0x2f   :  { %v116_v30 = vunpack.c.0.s8 %v115_v28  ;;  %v136_v36 = vsub.s32 0, %v100_v29 }
  0x30   :  { %vm104_vm6 = vcmp.gt.s32.totalorder %v102_v39, %v100_v29 }
  0x31   :  { %1941 = vmatpush3.bf16.msra.mxu0 %v2124_v3  ;;  %v119_v31 = vsub.s32 %v116_v30, %v100_v29 }
  0x32   :  { %1952 = vmatprep.subr.bf16.mxu0 %v2256_v1 }
  0x33   :  { %v120_v33 = vrot.slane %v1814_v32, %v119_v31  ;;  %v127_v35 = vrot.slane %v113_v34, %v119_v31 }
  0x34   :  { %1943 = vmatmul.mubr.msk.bf16.vlgmr.msra.gmra.mxu0 %vm172_vm1, %v148_v6 }
  0x35   :  { %1954 = vmatprep.mubr.msk.bf16.mxu0 %vm2257_vm0, %v2256_v1  ;;  %vm130_vm4 = vcmp.gt.f32.partialorder %v120_v33, 0.5  ;;  %vm131_vm5 = vcmp.gt.f32.partialorder %v127_v35, 0.5 }
  0x36   :  { %v132_v38 = vsel %vm130_vm4, 1, %v2262_v37  ;;  %v133_v41 = vsel %vm131_vm5, 1, %v2262_v37 }
  0x37   :  { %v137_v40 = vrot.slane %v132_v38, %v136_v36  ;;  %v141_v42 = vrot.slane %v133_v41, %v136_v36 }
  0x39   :  { %vm142_vm7 = vcmp.eq.s32.totalorder %v137_v40, 1  ;;  %vm143_vm9 = vcmp.eq.s32.totalorder %v141_v42, 1 }
  0x3a   :  { %vm144_vm8 = vmor %vm104_vm6, %vm142_vm7 }
  0x3b   :  { %v2423_v43 = vsel %vm144_vm8, -1e+09, %v2256_v1  ;;  %vm145_vm10 = vmor %vm104_vm6, %vm143_vm9 }
  0x3c   :  { %v2427_v47 = vsel %vm145_vm10, -1e+09, %v2256_v1 }
  0xf4   :  { %v210_v8 = vpop.f32.mrf.mxu0 }
  0xf5   :  { %v211_v9 = vadd.f32 %v1815_v7, %v210_v8 }
  0xf6   :  { %v1944_v10 = vpop.f32.mrf.mxu0 }
  0xf7   :  { %v2391_v11 = vpack.c.bf16 %v211_v9, %v211_v9  ;;  %v217_v16 = vmul.f32 0.25, %v211_v9 }
  0xf8   :  { %v213_v12 = vpop.f32.mrf.mxu0 }
  0xf9   :  { %v214_v13 = vadd.f32 %v1815_v7, %v213_v12  ;;  %224 = vrot.lane.b32.xlu0 %v2391_v11, %s2258_s18  ;;  %v219_v17 = vpack.c.bf16 %v217_v16, %v217_v16 }
  0xfa   :  { %v1945_v14 = vpop.f32.mrf.mxu0 }
  0xfb   :  { %v2395_v15 = vpack.c.bf16 %v214_v13, %v214_v13  ;;  %v218_v18 = vmul.f32 0.25, %v214_v13 }
  0xfd   :  { %274 = vrot.lane.b32.xlu0 %v2395_v15, %s2258_s18  ;;  %v220_v19 = vpack.c.bf16 %v218_v18, %v218_v18 }
 0x101   :  { %343 = vrot.lane.b32.xlu0 %v2391_v11, %s2248_s26 }
 0x105   :  { %447 = vrot.lane.b32.xlu0 %v2391_v11, %s2259_s19 }
 0x109   :  { %498 = vrot.lane.b32.xlu0 %v2395_v15, %s2259_s19 }
 0x10d   :  { %445 = vrot.lane.b32.xlu0 %v219_v17, %s2260_s20 }
 0x111   :  { %496 = vrot.lane.b32.xlu0 %v220_v19, %s2260_s20 }
 0x16b   :  { %v225_v20 = vpop.permute.xlu0 %224 }
 0x16c   :  { %v231_v21 = vsel %vm226_vm2, %v225_v20, 0 }
 0x16d   :  { %1947 = vmatpush3.bf16.xpose.msra.mxu1 %v231_v21 }
 0x16e   :  { %1958 = vmatprep.subr.bf16.mxu1 %v2256_v1 }
 0x16f   :  { %v275_v22 = vpop.permute.xlu0 %274 }
 0x170   :  { %v280_v23 = vsel %vm226_vm2, %v275_v22, 0 }
 0x171   :  { %1953 = vmatpush3.bf16.xpose.msra.mxu0 %v280_v23 }
 0x172   :  { %1964 = vmatprep.subr.bf16.mxu0 %v2256_v1 }
 0x173   :  { %v344_v24 = vpop.permute.xlu0 %343 }
 0x174   :  { %v350_v25 = vsel %vm348_vm3, %v344_v24, 0  ;;  %1949 = vmatmul.mubr.msk.bf16.vlgmr.msra.gmra.mxu1 %vm226_vm2, %v219_v17 }
 0x175   :  { %1959 = vmatpush3.bf16.msra.mxu1 %v350_v25  ;;  %1960 = vmatprep.mubr.msk.bf16.mxu1 %vm2257_vm0, %v2256_v1 }
 0x176   :  { %1970 = vmatprep.subr.bf16.mxu1 %v2256_v1 }
 0x177   :  { %v448_v2 = vpop.permute.xlu0 %447 }
 0x178   :  { %1955 = vmatmul.mubr.msk.bf16.vlgmr.msra.gmra.mxu0 %vm226_vm2, %v220_v19  ;;  %v453_v8 = vsel %vm226_vm2, %v448_v2, 0 }
 0x179   :  { %1966 = vmatprep.mubr.msk.bf16.mxu0 %vm2257_vm0, %v2256_v1 }
 0x17b   :  { %v499_v7 = vpop.permute.xlu0 %498 }
 0x17c   :  { %v504_v12 = vsel %vm226_vm2, %v499_v7, 0 }
 0x17f   :  { %v446_v13 = vpop.permute.xlu0 %445 }
 0x183   :  { %v497_v14 = vpop.permute.xlu0 %496 }
 0x234   :  { %v267_v44 = vpop.f32.mrf.mxu1 }
 0x235   :  { %v268_v45 = vadd.f32 %v267_v44, %v2423_v43 }
 0x236   :  { %v1950_v46 = vpop.f32.mrf.mxu1 }
 0x237   :  { %v323_v48 = vsel %vm322_vm11, %v268_v45, -inf }
 0x238   :  { %324 = vmax.xlane.f32.xlu1 %v323_v48  ;;  %v270_v49 = vpop.f32.mrf.mxu1  ;;  %v316_v50 = vpop.f32.mrf.mxu0 }
 0x239   :  { %v317_v51 = vadd.f32 %v316_v50, %v2427_v47 }
 0x23a   :  { %v1951_v52 = vpop.f32.mrf.mxu1  ;;  %v1956_v53 = vpop.f32.mrf.mxu0 }
 0x23b   :  { %v326_v54 = vsel %vm322_vm11, %v317_v51, -inf }
 0x23c   :  { %327 = vmax.xlane.f32.xlu1 %v326_v54  ;;  %v319_v55 = vpop.f32.mrf.mxu0  ;;  %v2125_v54 = vld [vmem:[#allocation5 + $0x8] sm:$0xff]  }
 0x23e   :  { %v1957_v56 = vpop.f32.mrf.mxu0 }
 0x24d   :  { %392 = vrot.lane.b32.xlu1 %v2395_v15, %s2248_s26 }
 0x2c1   :  { %v325_v57 = vpop.xlane.xlu1 %324 }
 0x2c2   :  { %v329_v58 = vsub.f32 %v268_v45, %v325_v57  ;;  %v2126_v57 = vld [vmem:[#allocation5] sm:$0xff]  }
 0x2c4   :  { %v331_v59 = vmul.f32 1.442695, %v329_v58 }
 0x2c5   :  { %v328_v60 = vpop.xlane.xlu1 %327 }
 0x2c6   :  { %2135 = vpow2.f32 %v331_v59  ;;  %v330_v61 = vsub.f32 %v317_v51, %v328_v60 }
 0x2c8   :  { %v333_v62 = vmul.f32 1.442695, %v330_v61 }
 0x2c9   :  { %v393_v63 = vpop.permute.xlu1 %392 }
 0x2ca   :  { %2137 = vpow2.f32 %v333_v62  ;;  %v398_v0 = vsel %vm348_vm3, %v393_v63, 0 }
 0x2cb   :  { %1965 = vmatpush3.bf16.msra.mxu0 %v398_v0 }
 0x2cc   :  { %1976 = vmatprep.subr.bf16.mxu0 %v2256_v1 }
 0x2d3   :  { %v2436_v3 = vpop.eup %2135 }
 0x2d4   :  { %v341_v6 = vpack.c.bf16 %v2436_v3, %v2436_v3  ;;  %v335_v53 = vsel %vm322_vm11, %v2436_v3, 0.0 }
 0x2d6   :  { %1961 = vmatmul.mubr.msk.bf16.vlgmr.msra.gmra.mxu1 %vm322_vm11, %v341_v6 }
 0x2d7   :  { %v2442_v9 = vpop.eup %2137  ;;  %1971 = vmatpush3.bf16.xpose.msra.mxu1 %v453_v8  ;;  %1972 = vmatprep.mubr.msk.bf16.mxu1 %vm2257_vm0, %v2256_v1 }
 0x2d8   :  { %v342_v10 = vpack.c.bf16 %v2442_v9, %v2442_v9  ;;  %1982 = vmatprep.subr.bf16.mxu1 %v2256_v1  ;;  %v338_v50 = vsel %vm322_vm11, %v2442_v9, 0.0 }
 0x2da   :  { %1967 = vmatmul.mubr.msk.bf16.vlgmr.msra.gmra.mxu0 %vm322_vm11, %v342_v10 }
 0x2db   :  { %1977 = vmatpush3.bf16.xpose.msra.mxu0 %v504_v12  ;;  %1978 = vmatprep.mubr.msk.bf16.mxu0 %vm2257_vm0, %v2256_v1 }
 0x2dc   :  { %1988 = vmatprep.subr.bf16.mxu0 %v2256_v1 }
 0x2de   :  { %1973 = vmatmul.mubr.msk.bf16.vlgmr.msra.gmra.mxu1 %vm226_vm2, %v446_v13 }
 0x2df   :  { %1984 = vmatprep.mubr.msk.bf16.mxu1 %vm2257_vm0, %v2256_v1 }
 0x2e2   :  { %1979 = vmatmul.mubr.msk.bf16.vlgmr.msra.gmra.mxu0 %vm226_vm2, %v497_v14 }
 0x2e3   :  { %1990 = vmatprep.mubr.msk.bf16.mxu0 %vm2257_vm0, %v2256_v1 }
 0x396   :  { %v2460_v16 = vpop.f32.mrf.mxu1 }
 0x398   :  { %v1962_v17 = vpop.f32.mrf.mxu1 }
 0x39a   :  { %v389_v18 = vpop.f32.mrf.mxu1  ;;  %v2462_v19 = vpop.f32.mrf.mxu0 }
 0x39c   :  { %v1963_v20 = vpop.f32.mrf.mxu1  ;;  %v1968_v21 = vpop.f32.mrf.mxu0 }
 0x39e   :  { %v437_v22 = vpop.f32.mrf.mxu0  ;;  %v489_v23 = vpop.f32.mrf.mxu1 }
 0x39f   :  { %v490_v24 = vadd.f32 %v489_v23, %v2423_v43 }
 0x3a0   :  { %v1969_v25 = vpop.f32.mrf.mxu0  ;;  %v1974_v26 = vpop.f32.mrf.mxu1 }
 0x3a1   :  { %v546_v27 = vsel %vm322_vm11, %v490_v24, -inf  ;;  %v1827_v26 = vld [vmem:[%s2720_s5] ss:$0 sm:$0xff] }
 0x3a2   :  { %v492_v28 = vpop.f32.mrf.mxu1  ;;  %547 = vmax.xlane.f32.xlu1 %v546_v27  ;;  %v540_v29 = vpop.f32.mrf.mxu0 }
 0x3a3   :  { %v541_v30 = vadd.f32 %v540_v29, %v2427_v47 }
 0x3a4   :  { %v1975_v31 = vpop.f32.mrf.mxu1  ;;  %v1980_v32 = vpop.f32.mrf.mxu0 }
 0x3a5   :  { %v549_v33 = vsel %vm322_vm11, %v541_v30, -inf }
 0x3a6   :  { %550 = vmax.xlane.f32.xlu0 %v549_v33  ;;  %v543_v34 = vpop.f32.mrf.mxu0 }
 0x3a8   :  { %v1981_v35 = vpop.f32.mrf.mxu0 }
 0x3b3   :  { %614 = vrot.lane.b32.xlu1 %v2395_v15, %s2263_s1 }
 0x3bc   :  { %566 = vrot.lane.b32.xlu0 %v2391_v11, %s2263_s1 }
 0x42b   :  { %v548_v36 = vpop.xlane.xlu1 %547 }
 0x42c   :  { %v552_v37 = vsub.f32 %v490_v24, %v548_v36 }
 0x42e   :  { %v554_v38 = vmul.f32 1.442695, %v552_v37 }
 0x42f   :  { %v615_v39 = vpop.permute.xlu1 %614  ;;  %v551_v40 = vpop.xlane.xlu0 %550 }
 0x430   :  { %2139 = vpow2.f32 %v554_v38  ;;  %v620_v41 = vsel %vm348_vm3, %v615_v39, 0  ;;  %v553_v42 = vsub.f32 %v541_v30, %v551_v40 }
 0x431   :  { %1989 = vmatpush3.bf16.msra.mxu0 %v620_v41 }
 0x432   :  { %v556_v44 = vmul.f32 1.442695, %v553_v42  ;;  %2002 = vmatprep.subr.bf16.mxu0 %v2256_v1 }
 0x433   :  { %v567_v45 = vpop.permute.xlu0 %566 }
 0x434   :  { %2141 = vpow2.f32 %v556_v44  ;;  %v572_v15 = vsel %vm348_vm3, %v567_v45, 0  ;;  %v2128_v45 = vld [vmem:[%s2723_s8] sm:$0xff]  }
 0x435   :  { %1983 = vmatpush3.bf16.msra.mxu1 %v572_v15 }
 0x436   :  { %1994 = vmatprep.subr.bf16.mxu1 %v2256_v1 }
 0x43d   :  { %v2140_v11 = vpop.eup %2139 }
 0x43e   :  { %v558_v46 = vsel %vm322_vm11, %v2140_v11, 0.0  ;;  %v564_v48 = vpack.c.bf16 %v2140_v11, %v2140_v11 }
 0x43f   :  { %559 = vadd.xlane.f32.xlu1 %v558_v46 }
 0x440   :  { %1985 = vmatmul.mubr.msk.bf16.vlgmr.msra.gmra.mxu1 %vm322_vm11, %v564_v48 }
 0x441   :  { %v2142_v49 = vpop.eup %2141  ;;  %1998 = vmatprep.mubr.msk.bf16.mxu1 %vm2257_vm0, %v2256_v1  ;;  %1995 = vmatpush3.bf16.msra.mxu1 %v2125_v54 }
 0x442   :  { %v561_v51 = vsel %vm322_vm11, %v2142_v49, 0.0  ;;  %v565_v52 = vpack.c.bf16 %v2142_v49, %v2142_v49  ;;  %1996 = vmatprep.subr.bf16.mxu1 %v2256_v1 }
 0x443   :  { %339 = vadd.xlane.f32.xlu1 %v338_v50  ;;  %562 = vadd.xlane.f32.xlu0 %v561_v51 }
 0x444   :  { %1991 = vmatmul.mubr.msk.bf16.vlgmr.msra.gmra.mxu0 %vm322_vm11, %v565_v52 }
 0x445   :  { %2006 = vmatprep.mubr.msk.bf16.mxu0 %vm2257_vm0, %v2256_v1  ;;  %1997 = vmatpush3.bf16.msra.mxu1 %v2126_v57  ;;  %v1832_v57 = vld [vmem:[#allocation7] ss:$0 sm:$0xff] }
 0x446   :  { %2010 = vmatprep.subr.bf16.mxu1 %v2256_v1 }
 0x447   :  { %336 = vadd.xlane.f32.xlu0 %v335_v53  ;;  %v1831_v53 = vld [vmem:[%s2721_s6] ss:$0 sm:$0xff] }
 0x4c8   :  { %v560_v55 = vpop.xlane.xlu1 %559 }
 0x4c9   :  { %2143 = vrcp.f32 %v560_v55 }
 0x4cc   :  { %v563_v56 = vpop.xlane.xlu0 %562  ;;  %v340_v10 = vpop.xlane.xlu1 %339 }
 0x4cd   :  { %2145 = vrcp.f32 %v563_v56 }
 0x4ce   :  { %2147 = vrcp.f32 %v340_v10 }
 0x4d0   :  { %v337_v12 = vpop.xlane.xlu0 %336 }
 0x4d1   :  { %2149 = vrcp.f32 %v337_v12 }
 0x4d6   :  { %v2144_v60 = vpop.eup %2143 }
 0x4da   :  { %v2146_v61 = vpop.eup %2145 }
 0x4db   :  { %v2148_v13 = vpop.eup %2147 }
 0x4dc   :  { %v443_v20 = vmul.f32 %v2148_v13, %v2462_v19 }
 0x4de   :  { %v2150_v14 = vpop.eup %2149 }
 0x4df   :  { %v442_v18 = vmul.f32 %v2150_v14, %v2460_v16  ;;  %v1837_v14 = vld [vmem:[%s2726_s11] ss:$0 sm:$0xff] }
 0x500   :  { %v608_v58 = vpop.f32.mrf.mxu1 }
 0x501   :  { %v664_v0 = vmul.f32 %v2144_v60, %v608_v58 }
 0x502   :  { %v1986_v59 = vpop.f32.mrf.mxu1 }
 0x504   :  { %v611_v62 = vpop.f32.mrf.mxu1  ;;  %v656_v63 = vpop.f32.mrf.mxu0 }
 0x505   :  { %v665_v2 = vmul.f32 %v2146_v61, %v656_v63  ;;  %v862_v62 = vld [vmem:[%s2725_s10] sm:$0xf] }
 0x506   :  { %v1987_v3 = vpop.f32.mrf.mxu1  ;;  %v1992_v6 = vpop.f32.mrf.mxu0  ;;  %v874_v63 = vsel %vm348_vm3, %v862_v62, 0 }
 0x507   :  { %v2113_v7 = vpack.i.bf16 %v665_v2, %v664_v0  ;;  %v1833_v0 = vld [vmem:[%s2724_s9] ss:$0 sm:$0xff] }
 0x508   :  { %v659_v8 = vpop.f32.mrf.mxu0 }
 0x509   :  { %2114 = vrot.lane.b32.xlu0 %v2113_v7, %s2254_s24 }
 0x50a   :  { %v1993_v9 = vpop.f32.mrf.mxu0 }
 0x57b   :  { %v2115_v17 = vpop.permute.xlu0 %2114 }
 0x57c   :  { %v2117_v21 = vunpack.i.h.bf16 %v2115_v17  ;;  %v2116_v22 = vunpack.i.l.bf16 %v2115_v17 }
 0x57e   :  { %v675_v23 = vsel %vm226_vm2, %v443_v20, %v2117_v21  ;;  %v674_v24 = vsel %vm226_vm2, %v442_v18, %v2116_v22 }
 0x57f   :  { %v676_v25 = vpack.c.bf16 %v675_v23, %v674_v24 }
 0x581   :  { %1999 = vmatmul.mubr.msk.bf16.vlgmr.msra.gmra.mxu1 %vm172_vm1, %v676_v25 }
 0x582   :  { %2012 = vmatprep.mubr.msk.bf16.mxu1 %vm2257_vm0, %v2256_v1  ;;  %2011 = vmatpush3.bf16.msra.mxu1 %v874_v63 }
 0x583   :  { %2024 = vmatprep.subr.bf16.mxu1 %v2256_v1 }
 0x641   :  { %v737_v27 = vpop.f32.mrf.mxu1 }
 0x642   :  { %v738_v16 = vadd.f32 %v1827_v26, %v737_v27 }
 0x643   :  { %v2000_v28 = vpop.f32.mrf.mxu1 }
 0x644   :  { %v744_v19 = vadd.f32 %v738_v16, %v2377_v4 }
 0x645   :  { %v740_v29 = vpop.f32.mrf.mxu1 }
 0x646   :  { %v741_v30 = vadd.f32 %v1827_v26, %v740_v29  ;;  %v746_v31 = vsel %vm172_vm1, %v744_v19, 0.0 }
 0x647   :  { %747 = vadd.xlane.f32.xlu1 %v746_v31  ;;  %v2001_v32 = vpop.f32.mrf.mxu1 }
 0x648   :  { %v745_v33 = vadd.f32 %v741_v30, %v2379_v5  ;;  %v2127_v5 = vld [vmem:[%s2723_s8 + $0x8] sm:$0xff]  }
 0x649   :  { %2003 = vmatpush3.bf16.msra.mxu0 %v2127_v5 }
 0x64a   :  { %v749_v34 = vsel %vm172_vm1, %v745_v33, 0.0  ;;  %2004 = vmatprep.subr.bf16.mxu0 %v2256_v1 }
 0x64b   :  { %750 = vadd.xlane.f32.xlu1 %v749_v34 }
 0x64d   :  { %2005 = vmatpush3.bf16.msra.mxu0 %v2128_v45  ;;  %v1839_v45 = vld [vmem:[%s2727_s12] ss:$0 sm:$0xff] }
 0x64e   :  { %2016 = vmatprep.subr.bf16.mxu0 %v2256_v1 }
 0x6d0   :  { %v748_v35 = vpop.xlane.xlu1 %747 }
 0x6d1   :  { %v753_v36 = vmul.f32 0.03125, %v748_v35 }
 0x6d3   :  { %v755_v37 = vsub.f32 %v744_v19, %v753_v36  ;;  %v2129_v36 = vld [vmem:[%s2717_s2 + $0x18] sm:$0xff]  }
 0x6d4   :  { %v751_v38 = vpop.xlane.xlu1 %750 }
 0x6d5   :  { %v754_v39 = vmul.f32 0.03125, %v751_v38  ;;  %v757_v40 = vmul.f32 %v755_v37, %v755_v37 }
 0x6d7   :  { %v756_v41 = vsub.f32 %v745_v33, %v754_v39  ;;  %v759_v4 = vsel %vm172_vm1, %v757_v40, 0.0 }
 0x6d8   :  { %760 = vadd.xlane.f32.xlu1 %v759_v4 }
 0x6d9   :  { %v758_v42 = vmul.f32 %v756_v41, %v756_v41 }
 0x6db   :  { %v762_v44 = vsel %vm172_vm1, %v758_v42, 0.0 }
 0x6dc   :  { %763 = vadd.xlane.f32.xlu1 %v762_v44 }
 0x761   :  { %v761_v15 = vpop.xlane.xlu1 %760 }
 0x762   :  { %v765_v11 = vmul.f32 0.03125, %v761_v15 }
 0x764   :  { %v767_v46 = vadd.f32 1e-05, %v765_v11 }
 0x765   :  { %v764_v48 = vpop.xlane.xlu1 %763 }
 0x766   :  { %2151 = vrsqrt.f32 %v767_v46  ;;  %v766_v49 = vmul.f32 0.03125, %v764_v48  ;;  %v1840_v48 = vld [vmem:[%s2728_s13] ss:$0 sm:$0xff] }
 0x768   :  { %v768_v50 = vadd.f32 1e-05, %v766_v49 }
 0x76a   :  { %2153 = vrsqrt.f32 %v768_v50 }
 0x773   :  { %v2152_v51 = vpop.eup %2151 }
 0x774   :  { %v771_v52 = vmul.f32 %v2152_v51, %v755_v37  ;;  %v2130_v37 = vld [vmem:[%s2717_s2 + $0x10] sm:$0xff]  }
 0x776   :  { %v780_v56 = vmul.f32 %v1831_v53, %v771_v52 }
 0x777   :  { %v2154_v54 = vpop.eup %2153 }
 0x778   :  { %v772_v55 = vmul.f32 %v2154_v54, %v756_v41  ;;  %v789_v59 = vadd.f32 %v1832_v57, %v780_v56 }
 0x77a   :  { %v781_v58 = vmul.f32 %v1831_v53, %v772_v55  ;;  %v1846_v53 = vld [vmem:[%s2718_s3 + $0x1] ss:$0 sm:$0xff] }
 0x77c   :  { %v790_v60 = vadd.f32 %v1832_v57, %v781_v58 }
 0x77e   :  { %v791_v61 = vpack.c.bf16 %v790_v60, %v789_v59 }
 0x780   :  { %2007 = vmatmul.mubr.msk.bf16.vlgmr.msra.gmra.mxu0 %vm172_vm1, %v791_v61 }
 0x781   :  { %2020 = vmatprep.mubr.msk.bf16.mxu0 %vm2257_vm0, %v2256_v1  ;;  %2017 = vmatpush3.bf16.msra.mxu0 %v2129_v36 }
 0x782   :  { %2018 = vmatprep.subr.bf16.mxu0 %v2256_v1 }
 0x785   :  { %2019 = vmatpush3.bf16.msra.mxu0 %v2130_v37 }
 0x786   :  { %2030 = vmatprep.subr.bf16.mxu0 %v2256_v1 }
 0x840   :  { %v852_v2 = vpop.f32.mrf.mxu0 }
 0x841   :  { %v853_v6 = vadd.f32 %v1833_v0, %v852_v2 }
 0x842   :  { %v2008_v3 = vpop.f32.mrf.mxu0 }
 0x843   :  { %v859_v10 = vmax.f32 %v853_v6, 0.0 }
 0x844   :  { %v855_v7 = vpop.f32.mrf.mxu0 }
 0x845   :  { %v856_v8 = vadd.f32 %v1833_v0, %v855_v7 }
 0x846   :  { %v2009_v9 = vpop.f32.mrf.mxu0 }
 0x847   :  { %v860_v12 = vmax.f32 %v856_v8, 0.0 }
 0x849   :  { %v861_v13 = vpack.c.bf16 %v860_v12, %v859_v10 }
 0x84b   :  { %2013 = vmatmul.mubr.msk.bf16.vlgmr.msra.gmra.mxu1 %vm322_vm11, %v861_v13 }
 0x84c   :  { %2026 = vmatprep.mubr.msk.bf16.mxu1 %vm2257_vm0, %v2256_v1 }
 0x90b   :  { %v910_v17 = vpop.f32.mrf.mxu1 }
 0x90c   :  { %v911_v18 = vadd.f32 %v1837_v14, %v910_v17 }
 0x90d   :  { %v2014_v20 = vpop.f32.mrf.mxu1 }
 0x90e   :  { %v917_v21 = vadd.f32 %v911_v18, %v789_v59 }
 0x90f   :  { %v913_v22 = vpop.f32.mrf.mxu1 }
 0x910   :  { %v914_v23 = vadd.f32 %v1837_v14, %v913_v22  ;;  %v919_v24 = vsel %vm172_vm1, %v917_v21, 0.0 }
 0x911   :  { %920 = vadd.xlane.f32.xlu1 %v919_v24  ;;  %v2015_v25 = vpop.f32.mrf.mxu1 }
 0x912   :  { %v918_v26 = vadd.f32 %v914_v23, %v790_v60 }
 0x914   :  { %v922_v27 = vsel %vm172_vm1, %v918_v26, 0.0 }
 0x915   :  { %923 = vadd.xlane.f32.xlu0 %v922_v27 }
 0x99a   :  { %v921_v16 = vpop.xlane.xlu1 %920 }
 0x99b   :  { %v925_v28 = vmul.f32 0.03125, %v921_v16 }
 0x99d   :  { %v927_v19 = vsub.f32 %v917_v21, %v925_v28 }
 0x99e   :  { %v924_v29 = vpop.xlane.xlu0 %923 }
 0x99f   :  { %v926_v30 = vmul.f32 0.03125, %v924_v29  ;;  %v929_v31 = vmul.f32 %v927_v19, %v927_v19 }
 0x9a1   :  { %v928_v32 = vsub.f32 %v918_v26, %v926_v30  ;;  %v931_v33 = vsel %vm172_vm1, %v929_v31, 0.0 }
 0x9a2   :  { %932 = vadd.xlane.f32.xlu1 %v931_v33 }
 0x9a3   :  { %v930_v34 = vmul.f32 %v928_v32, %v928_v32 }
 0x9a5   :  { %v934_v35 = vsel %vm172_vm1, %v930_v34, 0.0 }
 0x9a6   :  { %935 = vadd.xlane.f32.xlu1 %v934_v35 }
 0xa2b   :  { %v933_v38 = vpop.xlane.xlu1 %932 }
 0xa2c   :  { %v937_v39 = vmul.f32 0.03125, %v933_v38 }
 0xa2e   :  { %v939_v40 = vadd.f32 1e-05, %v937_v39 }
 0xa2f   :  { %v936_v41 = vpop.xlane.xlu1 %935 }
 0xa30   :  { %2155 = vrsqrt.f32 %v939_v40  ;;  %v938_v4 = vmul.f32 0.03125, %v936_v41 }
 0xa32   :  { %v940_v42 = vadd.f32 1e-05, %v938_v4 }
 0xa34   :  { %2157 = vrsqrt.f32 %v940_v42 }
 0xa3d   :  { %v2156_v44 = vpop.eup %2155 }
 0xa3e   :  { %v943_v5 = vmul.f32 %v2156_v44, %v927_v19 }
 0xa40   :  { %v952_v46 = vmul.f32 %v1839_v45, %v943_v5 }
 0xa41   :  { %v2158_v15 = vpop.eup %2157 }
 0xa42   :  { %v944_v11 = vmul.f32 %v2158_v15, %v928_v32  ;;  %v2553_v50 = vadd.f32 %v1840_v48, %v952_v46 }
 0xa44   :  { %v953_v49 = vmul.f32 %v1839_v45, %v944_v11 }
 0xa46   :  { %v2555_v51 = vadd.f32 %v1840_v48, %v953_v49 }
 0xa48   :  { %v963_v52 = vpack.c.bf16 %v2555_v51, %v2553_v50 }
 0xa4a   :  { %2021 = vmatmul.mubr.msk.bf16.vlgmr.msra.gmra.mxu0 %vm172_vm1, %v963_v52 }
 0xa4b   :  { %2032 = vmatprep.mubr.msk.bf16.mxu0 %vm2257_vm0, %v2256_v1 }
 0xb0a   :  { %v1026_v54 = vpop.f32.mrf.mxu0 }
 0xb0b   :  { %v1027_v55 = vadd.f32 %v1846_v53, %v1026_v54 }
 0xb0c   :  { %v2022_v56 = vpop.f32.mrf.mxu0 }
 0xb0d   :  { %v2565_v57 = vpack.c.bf16 %v1027_v55, %v1027_v55  ;;  %v1033_v0 = vmul.f32 0.25, %v1027_v55 }
 0xb0e   :  { %v1029_v58 = vpop.f32.mrf.mxu0 }
 0xb0f   :  { %v1030_v59 = vadd.f32 %v1846_v53, %v1029_v58  ;;  %1157 = vrot.lane.b32.xlu0 %v2565_v57, %s2248_s26  ;;  %1040 = vrot.lane.b32.xlu1 %v2565_v57, %s2258_s18  ;;  %v1035_v7 = vpack.c.bf16 %v1033_v0, %v1033_v0 }
 0xb10   :  { %v2023_v60 = vpop.f32.mrf.mxu0 }
 0xb11   :  { %v2571_v61 = vpack.c.bf16 %v1030_v59, %v1030_v59  ;;  %v1034_v8 = vmul.f32 0.25, %v1030_v59 }
 0xb13   :  { %1205 = vrot.lane.b32.xlu0 %v2571_v61, %s2248_s26  ;;  %1089 = vrot.lane.b32.xlu1 %v2571_v61, %s2258_s18  ;;  %v1036_v12 = vpack.c.bf16 %v1034_v8, %v1034_v8 }
 0xb81   :  { %v1041_v62 = vpop.permute.xlu1 %1040  ;;  %v1158_v2 = vpop.permute.xlu0 %1157 }
 0xb82   :  { %v1046_v63 = vsel %vm226_vm2, %v1041_v62, 0  ;;  %v1163_v9 = vsel %vm348_vm3, %v1158_v2, 0 }
 0xb83   :  { %2025 = vmatpush3.bf16.xpose.msra.mxu1 %v1046_v63 }
 0xb84   :  { %2036 = vmatprep.subr.bf16.mxu1 %v2256_v1 }
 0xb85   :  { %v1090_v3 = vpop.permute.xlu1 %1089  ;;  %v1206_v10 = vpop.permute.xlu0 %1205 }
 0xb86   :  { %v1095_v6 = vsel %vm226_vm2, %v1090_v3, 0  ;;  %v1211_v13 = vsel %vm348_vm3, %v1206_v10, 0 }
 0xb87   :  { %2031 = vmatpush3.bf16.xpose.msra.mxu0 %v1095_v6 }
 0xb88   :  { %2042 = vmatprep.subr.bf16.mxu0 %v2256_v1 }
 0xb8a   :  { %2027 = vmatmul.mubr.msk.bf16.vlgmr.msra.gmra.mxu1 %vm226_vm2, %v1035_v7 }
 0xb8b   :  { %2037 = vmatpush3.bf16.msra.mxu1 %v1163_v9  ;;  %2038 = vmatprep.mubr.msk.bf16.mxu1 %vm2257_vm0, %v2256_v1 }
 0xb8c   :  { %2048 = vmatprep.subr.bf16.mxu1 %v2256_v1 }
 0xb8e   :  { %2033 = vmatmul.mubr.msk.bf16.vlgmr.msra.gmra.mxu0 %vm226_vm2, %v1036_v12 }
 0xb8f   :  { %2043 = vmatpush3.bf16.msra.mxu0 %v1211_v13  ;;  %2044 = vmatprep.mubr.msk.bf16.mxu0 %vm2257_vm0, %v2256_v1 }
 0xb90   :  { %2054 = vmatprep.subr.bf16.mxu0 %v2256_v1 }
 0xc4a   :  { %v1082_v14 = vpop.f32.mrf.mxu1 }
 0xc4b   :  { %v1083_v17 = vadd.f32 %v1082_v14, %v2423_v43 }
 0xc4c   :  { %v2028_v18 = vpop.f32.mrf.mxu1 }
 0xc4d   :  { %v1137_v20 = vsel %vm322_vm11, %v1083_v17, -inf }
 0xc4e   :  { %v1085_v21 = vpop.f32.mrf.mxu1  ;;  %1138 = vmax.xlane.f32.xlu1 %v1137_v20  ;;  %v1131_v22 = vpop.f32.mrf.mxu0 }
 0xc4f   :  { %v1132_v23 = vadd.f32 %v1131_v22, %v2427_v47  ;;  %v2131_v22 = vld [vmem:[#allocation5 + $0x18] sm:$0xff]  }
 0xc50   :  { %v2029_v24 = vpop.f32.mrf.mxu1  ;;  %v2034_v25 = vpop.f32.mrf.mxu0 }
 0xc51   :  { %v1140_v26 = vsel %vm322_vm11, %v1132_v23, -inf  ;;  %v2132_v25 = vld [vmem:[#allocation5 + $0x10] sm:$0xff]  }
 0xc52   :  { %1141 = vmax.xlane.f32.xlu0 %v1140_v26  ;;  %v1134_v27 = vpop.f32.mrf.mxu0 }
 0xc54   :  { %v2035_v16 = vpop.f32.mrf.mxu0 }
 0xc5f   :  { %1258 = vrot.lane.b32.xlu1 %v1035_v7, %s2260_s20 }
 0xc68   :  { %1260 = vrot.lane.b32.xlu0 %v2565_v57, %s2259_s19 }
 0xc6c   :  { %1311 = vrot.lane.b32.xlu0 %v2571_v61, %s2259_s19 }
 0xc70   :  { %1309 = vrot.lane.b32.xlu0 %v1036_v12, %s2260_s20 }
 0xcd7   :  { %v1139_v28 = vpop.xlane.xlu1 %1138 }
 0xcd8   :  { %v1143_v19 = vsub.f32 %v1083_v17, %v1139_v28 }
 0xcda   :  { %v1145_v29 = vmul.f32 1.442695, %v1143_v19 }
 0xcdb   :  { %v1142_v30 = vpop.xlane.xlu0 %1141  ;;  %v1259_v41 = vpop.permute.xlu1 %1258 }
 0xcdc   :  { %2159 = vpow2.f32 %v1145_v29  ;;  %v1144_v31 = vsub.f32 %v1132_v23, %v1142_v30 }
 0xcde   :  { %v1147_v32 = vmul.f32 1.442695, %v1144_v31 }
 0xcdf   :  { %v1261_v33 = vpop.permute.xlu0 %1260 }
 0xce0   :  { %2161 = vpow2.f32 %v1147_v32  ;;  %v1266_v36 = vsel %vm226_vm2, %v1261_v33, 0 }
 0xce3   :  { %v1312_v38 = vpop.permute.xlu0 %1311 }
 0xce4   :  { %v1317_v40 = vsel %vm226_vm2, %v1312_v38, 0 }
 0xce7   :  { %v1310_v4 = vpop.permute.xlu0 %1309 }
 0xce9   :  { %v2601_v34 = vpop.eup %2159 }
 0xcea   :  { %v1155_v35 = vpack.c.bf16 %v2601_v34, %v2601_v34  ;;  %v1149_v17 = vsel %vm322_vm11, %v2601_v34, 0.0 }
 0xcec   :  { %2039 = vmatmul.mubr.msk.bf16.vlgmr.msra.gmra.mxu1 %vm322_vm11, %v1155_v35 }
 0xced   :  { %v2607_v37 = vpop.eup %2161  ;;  %2049 = vmatpush3.bf16.xpose.msra.mxu1 %v1266_v36  ;;  %2050 = vmatprep.mubr.msk.bf16.mxu1 %vm2257_vm0, %v2256_v1 }
 0xcee   :  { %v1156_v39 = vpack.c.bf16 %v2607_v37, %v2607_v37  ;;  %2060 = vmatprep.subr.bf16.mxu1 %v2256_v1  ;;  %v1152_v21 = vsel %vm322_vm11, %v2607_v37, 0.0 }
 0xcf0   :  { %2045 = vmatmul.mubr.msk.bf16.vlgmr.msra.gmra.mxu0 %vm322_vm11, %v1156_v39 }
 0xcf1   :  { %2055 = vmatpush3.bf16.xpose.msra.mxu0 %v1317_v40  ;;  %2056 = vmatprep.mubr.msk.bf16.mxu0 %vm2257_vm0, %v2256_v1 }
 0xcf2   :  { %2066 = vmatprep.subr.bf16.mxu0 %v2256_v1 }
 0xcf4   :  { %2051 = vmatmul.mubr.msk.bf16.vlgmr.msra.gmra.mxu1 %vm226_vm2, %v1259_v41 }
 0xcf5   :  { %2062 = vmatprep.mubr.msk.bf16.mxu1 %vm2257_vm0, %v2256_v1 }
 0xcf8   :  { %2057 = vmatmul.mubr.msk.bf16.vlgmr.msra.gmra.mxu0 %vm226_vm2, %v1310_v4 }
 0xcf9   :  { %2068 = vmatprep.mubr.msk.bf16.mxu0 %vm2257_vm0, %v2256_v1 }
 0xdac   :  { %v2625_v42 = vpop.f32.mrf.mxu1 }
 0xdae   :  { %v2040_v44 = vpop.f32.mrf.mxu1 }
 0xdb0   :  { %v1202_v5 = vpop.f32.mrf.mxu1  ;;  %v2627_v45 = vpop.f32.mrf.mxu0 }
 0xdb2   :  { %v2041_v15 = vpop.f32.mrf.mxu1  ;;  %v2046_v11 = vpop.f32.mrf.mxu0 }
 0xdb4   :  { %v1250_v46 = vpop.f32.mrf.mxu0  ;;  %v1302_v48 = vpop.f32.mrf.mxu1 }
 0xdb5   :  { %v1303_v49 = vadd.f32 %v1302_v48, %v2423_v43 }
 0xdb6   :  { %v2047_v52 = vpop.f32.mrf.mxu0  ;;  %v2052_v53 = vpop.f32.mrf.mxu1 }
 0xdb7   :  { %v1359_v54 = vsel %vm322_vm11, %v1303_v49, -inf }
 0xdb8   :  { %1360 = vmax.xlane.f32.xlu0 %v1359_v54  ;;  %v1305_v55 = vpop.f32.mrf.mxu1  ;;  %v1353_v56 = vpop.f32.mrf.mxu0 }
 0xdb9   :  { %v1354_v58 = vadd.f32 %v1353_v56, %v2427_v47 }
 0xdba   :  { %v2053_v59 = vpop.f32.mrf.mxu1  ;;  %v2058_v60 = vpop.f32.mrf.mxu0 }
 0xdbb   :  { %v1362_v62 = vsel %vm322_vm11, %v1354_v58, -inf }
 0xdbc   :  { %1363 = vmax.xlane.f32.xlu1 %v1362_v62  ;;  %v1356_v63 = vpop.f32.mrf.mxu0 }
 0xdbe   :  { %v2059_v0 = vpop.f32.mrf.mxu0 }
 0xdcd   :  { %1427 = vrot.lane.b32.xlu1 %v2571_v61, %s2263_s1 }
 0xdce   :  { %1379 = vrot.lane.b32.xlu0 %v2565_v57, %s2263_s1 }
 0xe41   :  { %v1361_v43 = vpop.xlane.xlu0 %1360 }
 0xe42   :  { %v1365_v2 = vsub.f32 %v1303_v49, %v1361_v43  ;;  %v1859_v49 = vld [vmem:[%s2720_s5 + $0x1] ss:$0 sm:$0xff] }
 0xe44   :  { %v1367_v3 = vmul.f32 1.442695, %v1365_v2 }
 0xe45   :  { %v1380_v6 = vpop.permute.xlu0 %1379  ;;  %v1364_v7 = vpop.xlane.xlu1 %1363 }
 0xe46   :  { %2163 = vpow2.f32 %v1367_v3  ;;  %v1385_v47 = vsel %vm348_vm3, %v1380_v6, 0  ;;  %v1366_v8 = vsub.f32 %v1354_v58, %v1364_v7 }
 0xe47   :  { %2061 = vmatpush3.bf16.msra.mxu1 %v1385_v47 }
 0xe48   :  { %v1369_v9 = vmul.f32 1.442695, %v1366_v8  ;;  %2072 = vmatprep.subr.bf16.mxu1 %v2256_v1  ;;  %v2134_v8 = vld [vmem:[%s2723_s8 + $0x10] sm:$0xff]  }
 0xe49   :  { %v1428_v10 = vpop.permute.xlu1 %1427 }
 0xe4a   :  { %2165 = vpow2.f32 %v1369_v9  ;;  %v1433_v61 = vsel %vm348_vm3, %v1428_v10, 0 }
 0xe4b   :  { %2067 = vmatpush3.bf16.msra.mxu0 %v1433_v61 }
 0xe4c   :  { %2080 = vmatprep.subr.bf16.mxu0 %v2256_v1 }
 0xe53   :  { %v2164_v57 = vpop.eup %2163 }
 0xe54   :  { %v1371_v12 = vsel %vm322_vm11, %v2164_v57, 0.0  ;;  %v1377_v13 = vpack.c.bf16 %v2164_v57, %v2164_v57 }
 0xe55   :  { %1372 = vadd.xlane.f32.xlu0 %v1371_v12 }
 0xe56   :  { %2063 = vmatmul.mubr.msk.bf16.vlgmr.msra.gmra.mxu1 %vm322_vm11, %v1377_v13 }
 0xe57   :  { %v2166_v14 = vpop.eup %2165  ;;  %2076 = vmatprep.mubr.msk.bf16.mxu1 %vm2257_vm0, %v2256_v1  ;;  %2073 = vmatpush3.bf16.msra.mxu1 %v2131_v22 }
 0xe58   :  { %v1374_v18 = vsel %vm322_vm11, %v2166_v14, 0.0  ;;  %v1378_v20 = vpack.c.bf16 %v2166_v14, %v2166_v14  ;;  %2074 = vmatprep.subr.bf16.mxu1 %v2256_v1 }
 0xe59   :  { %1150 = vadd.xlane.f32.xlu0 %v1149_v17  ;;  %1375 = vadd.xlane.f32.xlu1 %v1374_v18  ;;  %v1864_v18 = vld [vmem:[%s2721_s6 + $0x1] ss:$0 sm:$0xff] }
 0xe5a   :  { %2069 = vmatmul.mubr.msk.bf16.vlgmr.msra.gmra.mxu0 %vm322_vm11, %v1378_v20 }
 0xe5b   :  { %2084 = vmatprep.mubr.msk.bf16.mxu0 %vm2257_vm0, %v2256_v1  ;;  %2075 = vmatpush3.bf16.msra.mxu1 %v2132_v25 }
 0xe5c   :  { %2088 = vmatprep.subr.bf16.mxu1 %v2256_v1 }
 0xe5d   :  { %1153 = vadd.xlane.f32.xlu0 %v1152_v21 }
 0xede   :  { %v1373_v23 = vpop.xlane.xlu0 %1372 }
 0xedf   :  { %2167 = vrcp.f32 %v1373_v23  ;;  %v1865_v23 = vld [vmem:[#allocation7 + $0x1] ss:$0 sm:$0xff] }
 0xee2   :  { %v1376_v24 = vpop.xlane.xlu1 %1375  ;;  %v1151_v37 = vpop.xlane.xlu0 %1150 }
 0xee3   :  { %2169 = vrcp.f32 %v1376_v24 }
 0xee4   :  { %2171 = vrcp.f32 %v1151_v37  ;;  %v1877_v37 = vld [vmem:[%s2726_s11 + $0x1] ss:$0 sm:$0xff] }
 0xee6   :  { %v1154_v38 = vpop.xlane.xlu0 %1153 }
 0xee7   :  { %2173 = vrcp.f32 %v1154_v38 }
 0xeec   :  { %v2168_v16 = vpop.eup %2167 }
 0xef0   :  { %v2170_v28 = vpop.eup %2169 }
 0xef1   :  { %v2172_v39 = vpop.eup %2171 }
 0xef2   :  { %v1255_v4 = vmul.f32 %v2172_v39, %v2625_v42 }
 0xef4   :  { %v2174_v40 = vpop.eup %2173 }
 0xef5   :  { %v1256_v44 = vmul.f32 %v2174_v40, %v2627_v45 }
 0xf16   :  { %v1421_v26 = vpop.f32.mrf.mxu1 }
 0xf17   :  { %v1477_v30 = vmul.f32 %v2168_v16, %v1421_v26 }
 0xf18   :  { %v2064_v27 = vpop.f32.mrf.mxu1 }
 0xf19   :  { %v1875_v27 = vld [vmem:[%s2725_s10 + $0x4] sm:$0xf] }
 0xf1a   :  { %v1424_v19 = vpop.f32.mrf.mxu1  ;;  %v1469_v29 = vpop.f32.mrf.mxu0  ;;  %v1694_v16 = vsel %vm348_vm3, %v1875_v27, 0 }
 0xf1b   :  { %v1478_v31 = vmul.f32 %v2170_v28, %v1469_v29  ;;  %v1871_v28 = vld [vmem:[%s2724_s9 + $0x1] ss:$0 sm:$0xff] }
 0xf1c   :  { %v2065_v32 = vpop.f32.mrf.mxu1  ;;  %v2070_v33 = vpop.f32.mrf.mxu0 }
 0xf1d   :  { %v2118_v34 = vpack.i.bf16 %v1478_v31, %v1477_v30 }
 0xf1e   :  { %v1472_v35 = vpop.f32.mrf.mxu0 }
 0xf1f   :  { %2119 = vrot.lane.b32.xlu0 %v2118_v34, %s2254_s24 }
 0xf20   :  { %v2071_v36 = vpop.f32.mrf.mxu0 }
 0xf91   :  { %v2120_v41 = vpop.permute.xlu0 %2119 }
 0xf92   :  { %v2122_v5 = vunpack.i.h.bf16 %v2120_v41  ;;  %v2121_v15 = vunpack.i.l.bf16 %v2120_v41 }
 0xf94   :  { %v1488_v11 = vsel %vm226_vm2, %v1256_v44, %v2122_v5  ;;  %v1487_v46 = vsel %vm226_vm2, %v1255_v4, %v2121_v15 }
 0xf95   :  { %v1489_v48 = vpack.c.bf16 %v1488_v11, %v1487_v46 }
 0xf97   :  { %2077 = vmatmul.mubr.msk.bf16.vlgmr.msra.gmra.mxu1 %vm172_vm1, %v1489_v48 }
 0xf98   :  { %2090 = vmatprep.mubr.msk.bf16.mxu1 %vm2257_vm0, %v2256_v1  ;;  %2089 = vmatpush3.bf16.msra.mxu1 %v1694_v16 }
0x1057   :  { %v1552_v52 = vpop.f32.mrf.mxu1 }
0x1058   :  { %v1553_v42 = vadd.f32 %v1859_v49, %v1552_v52 }
0x1059   :  { %v2078_v53 = vpop.f32.mrf.mxu1 }
0x105a   :  { %v1559_v45 = vadd.f32 %v1553_v42, %v2553_v50 }
0x105b   :  { %v1555_v54 = vpop.f32.mrf.mxu1 }
0x105c   :  { %v1556_v55 = vadd.f32 %v1859_v49, %v1555_v54  ;;  %v1561_v56 = vsel %vm172_vm1, %v1559_v45, 0.0 }
0x105d   :  { %1562 = vadd.xlane.f32.xlu1 %v1561_v56  ;;  %v2079_v58 = vpop.f32.mrf.mxu1 }
0x105e   :  { %v1560_v59 = vadd.f32 %v1556_v55, %v2555_v51  ;;  %v2133_v51 = vld [vmem:[%s2723_s8 + $0x18] sm:$0xff]  }
0x105f   :  { %2081 = vmatpush3.bf16.msra.mxu0 %v2133_v51 }
0x1060   :  { %v1564_v60 = vsel %vm172_vm1, %v1560_v59, 0.0  ;;  %2082 = vmatprep.subr.bf16.mxu0 %v2256_v1 }
0x1061   :  { %1565 = vadd.xlane.f32.xlu1 %v1564_v60 }
0x1063   :  { %2083 = vmatpush3.bf16.msra.mxu0 %v2134_v8  ;;  %v1883_v8 = vld [vmem:[%s2729_s14] ss:$0 sm:$0xff] }
0x10e6   :  { %v1563_v62 = vpop.xlane.xlu1 %1562 }
0x10e7   :  { %v1567_v63 = vmul.f32 0.03125, %v1563_v62 }
0x10e9   :  { %v1569_v0 = vsub.f32 %v1559_v45, %v1567_v63 }
0x10ea   :  { %v1566_v43 = vpop.xlane.xlu1 %1565 }
0x10eb   :  { %v1568_v2 = vmul.f32 0.03125, %v1566_v43  ;;  %v1571_v3 = vmul.f32 %v1569_v0, %v1569_v0 }
0x10ed   :  { %v1570_v6 = vsub.f32 %v1560_v59, %v1568_v2  ;;  %v1573_v50 = vsel %vm172_vm1, %v1571_v3, 0.0  ;;  %v1800_v59 = vld [vmem:[#allocation2] sm:$0x1] }
0x10ee   :  { %1574 = vadd.xlane.f32.xlu1 %v1573_v50  ;;  %2094 = vpush %v1800_v59 }
0x10ef   :  { %v1572_v7 = vmul.f32 %v1570_v6, %v1570_v6 }
0x10f1   :  { %v1576_v47 = vsel %vm172_vm1, %v1572_v7, 0.0  ;;  %v1882_v7 = vld [vmem:[%s2728_s13 + $0x1] ss:$0 sm:$0xff] }
0x10f2   :  { %1577 = vadd.xlane.f32.xlu1 %v1576_v47 }
0x1177   :  { %v1575_v9 = vpop.xlane.xlu1 %1574 }
0x1178   :  { %v1579_v10 = vmul.f32 0.03125, %v1575_v9 }
0x117a   :  { %v1581_v61 = vadd.f32 1e-05, %v1579_v10 }
0x117b   :  { %v1578_v57 = vpop.xlane.xlu1 %1577 }
0x117c   :  { %2175 = vrsqrt.f32 %v1581_v61  ;;  %v1580_v12 = vmul.f32 0.03125, %v1578_v57 }
0x117e   :  { %v1582_v13 = vadd.f32 1e-05, %v1580_v12 }
0x1180   :  { %2177 = vrsqrt.f32 %v1582_v13 }
0x1189   :  { %v2176_v14 = vpop.eup %2175 }
0x118a   :  { %v1585_v17 = vmul.f32 %v2176_v14, %v1569_v0 }
0x118c   :  { %v1595_v22 = vmul.f32 %v1864_v18, %v1585_v17 }
0x118d   :  { %v2178_v20 = vpop.eup %2177 }
0x118e   :  { %v1586_v21 = vmul.f32 %v2178_v20, %v1570_v6  ;;  %v1605_v24 = vadd.f32 %v1865_v23, %v1595_v22  ;;  %v1880_v6 = vld [vmem:[%s2727_s12 + $0x1] ss:$0 sm:$0xff]  ;;  %s2095_s12 = spop %2094 }
0x1190   :  { %v1596_v1 = vmul.f32 %v1864_v18, %v1586_v21  ;;  %v1802_v18 = vstv %s2095_s12 }
0x1192   :  { %v1606_v25 = vadd.f32 %v1865_v23, %v1596_v1 }
0x1194   :  { %v1607_v26 = vpack.c.bf16 %v1606_v25, %v1605_v24 }
0x1196   :  { %2085 = vmatmul.mubr.msk.bf16.vlgmr.msra.gmra.mxu0 %vm172_vm1, %v1607_v26 }
0x1256   :  { %v1670_v19 = vpop.f32.mrf.mxu0 }
0x1257   :  { %v1671_v30 = vadd.f32 %v1871_v28, %v1670_v19 }
0x1258   :  { %v2086_v29 = vpop.f32.mrf.mxu0 }
0x1259   :  { %v1677_v34 = vmax.f32 %v1671_v30, 0.0 }
0x125a   :  { %v1673_v31 = vpop.f32.mrf.mxu0 }
0x125b   :  { %v1674_v32 = vadd.f32 %v1871_v28, %v1673_v31 }
0x125c   :  { %v2087_v33 = vpop.f32.mrf.mxu0 }
0x125d   :  { %v1678_v35 = vmax.f32 %v1674_v32, 0.0 }
0x125f   :  { %v1679_v36 = vpack.c.bf16 %v1678_v35, %v1677_v34 }
0x1261   :  { %2091 = vmatmul.mubr.msk.bf16.vlgmr.msra.gmra.mxu1 %vm322_vm11, %v1679_v36 }
0x1321   :  { %v1730_v38 = vpop.f32.mrf.mxu1 }
0x1322   :  { %v1731_v39 = vadd.f32 %v1877_v37, %v1730_v38 }
0x1323   :  { %v2092_v40 = vpop.f32.mrf.mxu1 }
0x1324   :  { %v1737_v41 = vadd.f32 %v1731_v39, %v1605_v24 }
0x1325   :  { %v1733_v4 = vpop.f32.mrf.mxu1 }
0x1326   :  { %v1734_v44 = vadd.f32 %v1877_v37, %v1733_v4  ;;  %v1739_v5 = vsel %vm172_vm1, %v1737_v41, 0.0 }
0x1327   :  { %1740 = vadd.xlane.f32.xlu0 %v1739_v5  ;;  %v2093_v15 = vpop.f32.mrf.mxu1 }
0x1328   :  { %v1738_v11 = vadd.f32 %v1734_v44, %v1606_v25 }
0x132a   :  { %v1742_v46 = vsel %vm172_vm1, %v1738_v11, 0.0 }
0x132b   :  { %1743 = vadd.xlane.f32.xlu1 %v1742_v46 }
0x13b0   :  { %v1741_v48 = vpop.xlane.xlu0 %1740 }
0x13b1   :  { %v1745_v49 = vmul.f32 0.03125, %v1741_v48 }
0x13b3   :  { %v1747_v52 = vsub.f32 %v1737_v41, %v1745_v49 }
0x13b4   :  { %v1744_v42 = vpop.xlane.xlu1 %1743 }
0x13b5   :  { %v1746_v53 = vmul.f32 0.03125, %v1744_v42  ;;  %v1749_v45 = vmul.f32 %v1747_v52, %v1747_v52 }
0x13b7   :  { %v1748_v54 = vsub.f32 %v1738_v11, %v1746_v53  ;;  %v1751_v55 = vsel %vm172_vm1, %v1749_v45, 0.0 }
0x13b8   :  { %1752 = vadd.xlane.f32.xlu1 %v1751_v55 }
0x13b9   :  { %v1750_v56 = vmul.f32 %v1748_v54, %v1748_v54 }
0x13bb   :  { %v1754_v58 = vsel %vm172_vm1, %v1750_v56, 0.0 }
0x13bc   :  { %1755 = vadd.xlane.f32.xlu1 %v1754_v58 }
0x1441   :  { %v1753_v60 = vpop.xlane.xlu1 %1752 }
0x1442   :  { %v1757_v62 = vmul.f32 0.03125, %v1753_v60 }
0x1444   :  { %v1759_v63 = vadd.f32 1e-05, %v1757_v62 }
0x1445   :  { %v1756_v0 = vpop.xlane.xlu1 %1755 }
0x1446   :  { %2179 = vrsqrt.f32 %v1759_v63  ;;  %v1758_v43 = vmul.f32 0.03125, %v1756_v0 }
0x1448   :  { %v1760_v2 = vadd.f32 1e-05, %v1758_v43 }
0x144a   :  { %2181 = vrsqrt.f32 %v1760_v2 }
0x1453   :  { %v2180_v3 = vpop.eup %2179 }
0x1454   :  { %v1763_v50 = vmul.f32 %v2180_v3, %v1747_v52 }
0x1456   :  { %v1773_v47 = vmul.f32 %v1880_v6, %v1763_v50 }
0x1457   :  { %v2182_v51 = vpop.eup %2181 }
0x1458   :  { %v1783_v9 = vadd.f32 %v1882_v7, %v1773_v47  ;;  %v1764_v10 = vmul.f32 %v2182_v51, %v1748_v54 }
0x145a   :  { %v1792_v61 = vmul.f32 %v1883_v8, %v1783_v9  ;;  %v1774_v57 = vmul.f32 %v1880_v6, %v1764_v10 }
0x145c   :  { %v1794_v12 = vsel %vm172_vm1, %v1792_v61, 0.0  ;;  %v1784_v13 = vadd.f32 %v1882_v7, %v1774_v57 }
0x145d   :  { %1795 = vadd.xlane.f32.xlu1 %v1794_v12 }
0x145e   :  { %v1793_v14 = vmul.f32 %v1883_v8, %v1784_v13 }
0x1460   :  { %v1797_v17 = vsel %vm172_vm1, %v1793_v14, 0.0 }
0x1461   :  { %1798 = vadd.xlane.f32.xlu1 %v1797_v17 }
0x14e6   :  { %v1796_v20 = vpop.xlane.xlu1 %1795 }
0x14e7   :  { %v1803_v21 = vadd.f32 %v1802_v18, %v1796_v20 }
0x14e9   :  { %1806 = vst.msk [vmem:[%s2731_s16] sm:$0xff] %vm1805_vm12, %v1803_v21 }
0x14ea   :  { %v1799_v22 = vpop.xlane.xlu1 %1798 }
0x14eb   :  { %v1804_v23 = vadd.f32 %v1802_v18, %v1799_v22 }
0x14ed   :  { %1807 = vst.msk [vmem:[%s2731_s16 + $0x8] sm:$0xff] %vm1805_vm12, %v1804_v23 }
0x14ee   :  { %1812 = vsyncpa [#allocation4], 1 }
0x14ef   :  { %1813 = vsyncpa [#allocation6], 1 }

</bundles_post_ra>
